<compile_context>
chip_gen: v6e
topology: v6e:2x2x1
jax: 0.10.0
libtpu: 0.0.40
codegen_flags: <defaults>
</compile_context>

<pallas_src>
import jax
import jax.numpy as jnp
import numpy as np
from jax.experimental import pallas as pl
from jax.experimental.pallas import tpu as pltpu


def make_gblock_kernel(upsampling, tile_h, compute_dtype):
    UP = 2 if upsampling else 1
    HALO = 1 if upsampling else 2      # pre-upsample halo rows needed per side

    def kernel(x_ref, w1t_ref, w31_ref, b31_ref, w32t_ref, bout_ref,
               scale_ref, shift_ref, o_ref, pad_ref):
        # x_ref  : (1, 1, tile_h + 2*HALO, W, Cin)   pre-upsample slab (f32)
        # o_ref  : (1, Cout, UP*tile_h * UP*W)        channel-major, lane-dense
        # pad_ref: (UP*tile_h + 4, UP*W + 2, Cin)     zero-padded scratch, reused
        #          by both 3x3 convs
        THp = x_ref.shape[2]
        W = x_ref.shape[3]
        Cin = x_ref.shape[4]
        W2 = UP * W
        TU = UP * tile_h               # output rows produced by this tile
        S1 = TU + 2                    # conv3_1 output rows (1-row halo each side)

        ht = pl.program_id(1)
        first = ht == 0
        last = ht == pl.num_programs(1) - 1

        scale = scale_ref[...]         # (1, Cin)
        shift = shift_ref[...]         # (1, Cin)
        dn = (((1,), (1,)), ((), ()))  # contract last dims (q @ k^T style)

        def up_hw(v):
            # nearest-neighbour 2x upsample in VMEM: W first (fewer rows in the
            # expensive interleave), then H (cheap leading-dim duplication).
            if not upsampling:
                return v
            r, w, c = v.shape
            v = jnp.broadcast_to(v[:, :, None, :], (r, w, 2, c)).reshape(r, 2 * w, c)
            v = jnp.broadcast_to(v[:, None, :, :], (r, 2, 2 * w, c)).reshape(
                2 * r, 2 * w, c)
            return v

        # ---- zero the 1-pixel W-halo columns of the scratch (thin strips; kept
        # per-step because first-step-only init is unsafe under "parallel").
        pad_ref[:, 0:1, :] = jnp.zeros((TU + 4, 1, Cin), jnp.float32)
        pad_ref[:, W2 + 1:W2 + 2, :] = jnp.zeros((TU + 4, 1, Cin), jnp.float32)

        # ---- path 2, stage 1: BN -> ReLU on the small pre-upsample slab (BN and
        # ReLU commute with NN upsampling), then upsample in VMEM and write into
        # the padded scratch interior.
        xs = x_ref[0, 0]                                             # (THp, W, Cin)
        y = jnp.maximum(xs.reshape(THp * W, Cin) * scale + shift, 0.0)
        pad_ref[:, 1:W2 + 1, :] = up_hw(y.reshape(THp, W, Cin))      # (TU+4, W2, Cin)

        # conv zero-padding rows at the image top/bottom (applied AFTER BN/ReLU —
        # the conv pads with zeros, not with BN(0)).
        @pl.when(first)
        def _():
            pad_ref[0:2, :, :] = jnp.zeros((2, W2 + 2, Cin), jnp.float32)

        @pl.when(last)
        def _():
            pad_ref[TU + 2:TU + 4, :, :] = jnp.zeros((2, W2 + 2, Cin), jnp.float32)

        # ---- conv3_1: only the (rows, W2, 3*Cin) dx lane-concat is materialized;
        # the dy taps are 3 accumulated matmuls (K = 3*Cin), f32 accumulation.
        rows1 = jnp.concatenate(
            [pad_ref[:, dx:dx + W2, :] for dx in range(3)], axis=2)   # (TU+4, W2, 3Cin)
        t1 = b31_ref[...]                                             # (1, Cin)
        for dy in range(3):
            a = rows1[dy:dy + S1].reshape(S1 * W2, 3 * Cin).astype(compute_dtype)
            t1 = t1 + jnp.dot(a, w31_ref[dy],
                              preferred_element_type=jnp.float32)     # (S1*W2, Cin)

        # BN -> ReLU, write back into the (reused) padded scratch for conv3_2.
        y2 = jnp.maximum(t1 * scale + shift, 0.0).reshape(S1, W2, Cin)
        pad_ref[0:S1, 1:W2 + 1, :] = y2

        @pl.when(first)
        def _():
            pad_ref[0:1, :, :] = jnp.zeros((1, W2 + 2, Cin), jnp.float32)

        @pl.when(last)
        def _():
            pad_ref[S1 - 1:S1, :, :] = jnp.zeros((1, W2 + 2, Cin), jnp.float32)

        # ---- conv3_2, produced channel-major (Cout, TU*W2) so the HBM store is
        # lane-dense and the wrapper needs only a free trailing reshape.
        p2 = pad_ref[0:S1, :, :]                                      # (S1, W2+2, Cin)
        rows2 = jnp.concatenate(
            [p2[:, dx:dx + W2, :] for dx in range(3)], axis=2)        # (S1, W2, 3Cin)
        out_t = bout_ref[...]                                         # (Cout, 1)
        for dy in range(3):
            a = rows2[dy:dy + TU].reshape(TU * W2, 3 * Cin).astype(compute_dtype)
            out_t = out_t + jax.lax.dot_general(
                w32t_ref[dy], a, dn,
                preferred_element_type=jnp.float32)                   # (Cout, TU*W2)

        # ---- path 1: 1x1 grouped conv on the (upsampled) raw input, computed
        # last so its intermediates have short live ranges.
        xu = up_hw(xs[HALO:HALO + tile_h])                            # (TU, W2, Cin)
        out_t = out_t + jax.lax.dot_general(
            w1t_ref[...], xu.reshape(TU * W2, Cin).astype(compute_dtype), dn,
            preferred_element_type=jnp.float32)

        o_ref[0] = out_t.astype(o_ref.dtype)

    return kernel


# ---------------------------------------------------------------------------
# Parameter construction (PyTorch OIHW layout + dense block-diagonal versions)
# ---------------------------------------------------------------------------
def _dense_1x1(w_pt, cin, cout):
    cpg = cin // cout
    wp = np.asarray(w_pt)
    w = np.zeros((cin, cout), np.float32)
    for g in range(cout):
        for j in range(cpg):
            w[g * cpg + j, g] = wp[g, j, 0, 0]
    return jnp.asarray(w)


def _dense_3x3(w_pt, cin, cout_total, groups):
    cpg_in = cin // groups
    opg = cout_total // groups
    wp = np.asarray(w_pt)
    w = np.zeros((9, cin, cout_total), np.float32)
    for g in range(groups):
        for oo in range(opg):
            o = g * opg + oo
            for j in range(cpg_in):
                c = g * cpg_in + j
                for ky in range(3):
                    for kx in range(3):
                        w[ky * 3 + kx, c, o] = wp[o, j, ky, kx]
    return jnp.asarray(w)


def build_params(key, cin, cout):
    assert cin % cout == 0, "groups=out_channels requires in_channels % out_channels == 0"
    cpg = cin // cout
    ks = jax.random.split(key, 10)
    w1_pt = 0.3 * jax.random.normal(ks[0], (cout, cpg, 1, 1), jnp.float32)
    b1 = 0.1 * jax.random.normal(ks[1], (cout,), jnp.float32)
    w31_pt = 0.2 * jax.random.normal(ks[2], (cin, cpg, 3, 3), jnp.float32)
    b31 = 0.1 * jax.random.normal(ks[3], (cin,), jnp.float32)
    w32_pt = 0.2 * jax.random.normal(ks[4], (cout, cpg, 3, 3), jnp.float32)
    b32 = 0.1 * jax.random.normal(ks[5], (cout,), jnp.float32)
    gamma = 1.0 + 0.1 * jax.random.normal(ks[6], (cin,), jnp.float32)
    beta = 0.1 * jax.random.normal(ks[7], (cin,), jnp.float32)
    rmean = 0.1 * jax.random.normal(ks[8], (cin,), jnp.float32)
    rvar = 0.5 + jax.random.uniform(ks[9], (cin,), jnp.float32)
    eps = 1e-5
    bn_scale = gamma / jnp.sqrt(rvar + eps)
    bn_shift = beta - rmean * bn_scale
    return dict(
        w1_pt=w1_pt, b1=b1, w31_pt=w31_pt, b31=b31, w32_pt=w32_pt, b32=b32,
        bn_scale=bn_scale, bn_shift=bn_shift,
        w1_dense=_dense_1x1(w1_pt, cin, cout),
        w31_dense=_dense_3x3(w31_pt, cin, cin, cout),
        w32_dense=_dense_3x3(w32_pt, cin, cout, cout),
    )


# ---------------------------------------------------------------------------
# Pallas wrapper (NCHW in, NCHW out — matches PyTorch semantics)
# ---------------------------------------------------------------------------
def _default_tile_h(H, W, up):
    # Smallest H tile whose flattened upsampled output block is lane-dense
    # (multiple of 128 lanes) and large enough to amortize per-grid-step overhead.
    # TODO(synk): size per generation against VMEM (64 MiB v7x vs 128 MiB v5e/v6e)
    #             and consider pl.Buffered(3) on the slab spec if DMA is exposed.
    for th in range(1, H + 1):
        if H % th:
            continue
        lanes = up * th * up * W
        if lanes % 128 == 0 and lanes >= 4096:
            return th
    return H


def gblock_forward(x_nchw, params, upsampling=True, tile_h=None,
                   compute_dtype=jnp.bfloat16):
    N, Cin, H, W = x_nchw.shape
    Cout = params["w1_pt"].shape[0]
    assert Cin % Cout == 0
    UP = 2 if upsampling else 1
    HALO = 1 if upsampling else 2
    H2, W2 = UP * H, UP * W

    if tile_h is None:
        tile_h = _default_tile_h(H, W, UP)
    assert H % tile_h == 0
    assert tile_h == H or (UP * tile_h * W2) % 128 == 0, \
        "per-tile flattened output must be lane-dense (multiple of 128)"
    nH = H // tile_h
    THp = tile_h + 2 * HALO
    TU = UP * tile_h

    # Single relayout pass over the SMALL pre-upsample input: NCHW -> NHWC plus
    # per-tile halo-row slabs (pad+transpose+stack fuse in XLA).  No 2x spatial
    # repeat in HBM — both H and W nearest-neighbour duplication happen in VMEM.
    x_nhwc = jnp.transpose(x_nchw, (0, 2, 3, 1))                      # (N, H, W, Cin)
    xp = jnp.pad(x_nhwc, ((0, 0), (HALO, HALO), (0, 0), (0, 0)))
    x_slabs = jnp.stack(
        [xp[:, i * tile_h:i * tile_h + THp] for i in range(nH)],
        axis=1)                                                       # (N, nH, THp, W, Cin)

    # im2col / channel-major weight layouts (host-side, free); MXU operands are
    # stored in compute_dtype so weight DMA bytes are halved in bf16 mode.
    w1t = params["w1_dense"].T.astype(compute_dtype)                  # (Cout, Cin)
    w31 = params["w31_dense"].reshape(3, 3 * Cin, Cin).astype(compute_dtype)
    w32t = jnp.transpose(params["w32_dense"].reshape(3, 3 * Cin, Cout),
                         (0, 2, 1)).astype(compute_dtype)             # (3, Cout, 3*Cin)
    bout = (params["b1"] + params["b32"]).reshape(Cout, 1)
    b31 = params["b31"].reshape(1, Cin)
    scale = params["bn_scale"].reshape(1, Cin)
    shift = params["bn_shift"].reshape(1, Cin)

    out_flat = pl.pallas_call(
        make_gblock_kernel(upsampling, tile_h, compute_dtype),
        out_shape=jax.ShapeDtypeStruct((N, Cout, H2 * W2), jnp.float32),
        grid_spec=pltpu.PrefetchScalarGridSpec(
            num_scalar_prefetch=0,
            grid=(N, nH),
            in_specs=[
                pl.BlockSpec((1, 1, THp, W, Cin), lambda n, h: (n, h, 0, 0, 0)),
                pl.BlockSpec((Cout, Cin), lambda n, h: (0, 0)),
                pl.BlockSpec((3, 3 * Cin, Cin), lambda n, h: (0, 0, 0)),
                pl.BlockSpec((1, Cin), lambda n, h: (0, 0)),
                pl.BlockSpec((3, Cout, 3 * Cin), lambda n, h: (0, 0, 0)),
                pl.BlockSpec((Cout, 1), lambda n, h: (0, 0)),
                pl.BlockSpec((1, Cin), lambda n, h: (0, 0)),
                pl.BlockSpec((1, Cin), lambda n, h: (0, 0)),
            ],
            out_specs=pl.BlockSpec((1, Cout, TU * W2), lambda n, h: (n, 0, h)),
            scratch_shapes=[pltpu.VMEM((TU + 4, W2 + 2, Cin), jnp.float32)],
        ),
        compiler_params=pltpu.CompilerParams(
            # Both axes are independent: batch AND H-tile parallelism keeps both
            # v7x TensorCores busy even at N=1.
            dimension_semantics=("parallel", "parallel"),
            vmem_limit_bytes=48 * 1024 * 1024,  # TODO(synk): per-generation tuning
        ),
    )(x_slabs, w1t, w31, b31, w32t, bout, scale, shift)

    # (N, Cout, H2*W2) -> (N, Cout, H2, W2): trailing-dim split, no transpose.
    return out_flat.reshape(N, Cout, H2, W2)


# ---------------------------------------------------------------------------
# Pure-JAX reference (lax grouped convs on PyTorch-layout weights)
# ---------------------------------------------------------------------------
def ref_forward(x, params, upsampling=True):
    scale, shift = params["bn_scale"], params["bn_shift"]
    cout = params["w1_pt"].shape[0]

    def bn(z):
        return z * scale[None, :, None, None] + shift[None, :, None, None]

    def up(z):
        return jnp.repeat(jnp.repeat(z, 2, axis=2), 2, axis=3) if upsampling else z

    def conv(z, w, b, pad, groups):
        y = jax.lax.conv_general_dilated(
            z, w, window_strides=(1, 1), padding=pad,
            dimension_numbers=("NCHW", "OIHW", "NCHW"),
            feature_group_count=groups)
        return y + b[None, :, None, None]

    x1 = conv(up(x), params["w1_pt"], params["b1"], "VALID", cout)
    x2 = jnp.maximum(bn(x), 0.0)
    x2 = up(x2)
    x2 = conv(x2, params["w31_pt"], params["b31"], ((1, 1), (1, 1)), cout)
    x2 = jnp.maximum(bn(x2), 0.0)
    x2 = conv(x2, params["w32_pt"], params["b32"], ((1, 1), (1, 1)), cout)
    return x1 + x2


if __name__ == "__main__":
    key = jax.random.PRNGKey(0)
    kx, kp, kx2, kp2 = jax.random.split(key, 4)

    # -- tests 1/2: upsampling=True, two H tiles (tile_h=4); f32 parity + bf16 path
    N, Cin, Cout, H, W = 2, 8, 4, 8, 8
    x = jax.random.normal(kx, (N, Cin, H, W), jnp.float32)
    params = build_params(kp, Cin, Cout)
    ref = ref_forward(x, params, upsampling=True)

    out_f32 = jax.block_until_ready(
        gblock_forward(x, params, upsampling=True, tile_h=4,
                       compute_dtype=jnp.float32))
    assert out_f32.shape == (N, Cout, 2 * H, 2 * W), out_f32.shape
    np.testing.assert_allclose(np.asarray(out_f32), np.asarray(ref),
                               rtol=1e-4, atol=2e-4)

    out_bf16 = jax.block_until_ready(
        gblock_forward(x, params, upsampling=True, tile_h=4))  # default bf16 MXU operands
    np.testing.assert_allclose(np.asarray(out_bf16), np.asarray(ref),
                               rtol=5e-2, atol=8e-2)

    # -- test 3: upsampling=False, single tile (2-row pre-upsample halo path)
    out_nu = jax.block_until_ready(
        gblock_forward(x, params, upsampling=False, compute_dtype=jnp.float32))
    ref_nu = ref_forward(x, params, upsampling=False)
    assert out_nu.shape == (N, Cout, H, W), out_nu.shape
    np.testing.assert_allclose(np.asarray(out_nu), np.asarray(ref_nu),
                               rtol=1e-4, atol=2e-4)

    # -- test 4: upsampling=False, two H tiles with 2-row halos, other channel counts
    N4, Cin4, Cout4, H4, W4 = 1, 12, 4, 16, 16
    x4 = jax.random.normal(kx2, (N4, Cin4, H4, W4), jnp.float32)
    params4 = build_params(kp2, Cin4, Cout4)
    out4 = jax.block_until_ready(
        gblock_forward(x4, params4, upsampling=False, tile_h=8,
                       compute_dtype=jnp.float32))
    ref4 = ref_forward(x4, params4, upsampling=False)
    assert out4.shape == (N4, Cout4, H4, W4), out4.shape
    np.testing.assert_allclose(np.asarray(out4), np.asarray(ref4),
                               rtol=1e-4, atol=2e-4)

    print("KERNEL_OK")
</pallas_src>

<mosaic_0001>
module attributes {stable_mosaic.version = 11 : i64} {
  func.func @kernel(%arg0: i32, %arg1: i32, %arg2: memref<1x1x6x8x8xf32, #tpu.memory_space<vmem>>, %arg3: memref<4x8xf32, #tpu.memory_space<vmem>>, %arg4: memref<3x24x8xf32, #tpu.memory_space<vmem>>, %arg5: memref<1x8xf32, #tpu.memory_space<vmem>>, %arg6: memref<3x4x24xf32, #tpu.memory_space<vmem>>, %arg7: memref<4x1xf32, #tpu.memory_space<vmem>>, %arg8: memref<1x8xf32, #tpu.memory_space<vmem>>, %arg9: memref<1x8xf32, #tpu.memory_space<vmem>>, %arg10: memref<1x4x128xf32, #tpu.memory_space<vmem>>, %arg11: memref<12x18x8xf32, #tpu.memory_space<vmem>>) attributes {dimension_semantics = [#tpu.dimension_semantics<parallel>, #tpu.dimension_semantics<parallel>], iteration_bounds = array<i64: 2, 2>, scalar_prefetch = 0 : i64, scratch_operands = 1 : i64, tpu.core_type = #tpu.core_type<tc>, window_params = [{transform_indices = @transform_0, window_bounds = array<i64: 1, 1, 6, 8, 8>}, {pipeline_mode = #tpu.pipeline_mode<synchronous>, transform_indices = @transform_1, window_bounds = array<i64: 4, 8>}, {pipeline_mode = #tpu.pipeline_mode<synchronous>, transform_indices = @transform_2, window_bounds = array<i64: 3, 24, 8>}, {pipeline_mode = #tpu.pipeline_mode<synchronous>, transform_indices = @transform_3, window_bounds = array<i64: 1, 8>}, {pipeline_mode = #tpu.pipeline_mode<synchronous>, transform_indices = @transform_4, window_bounds = array<i64: 3, 4, 24>}, {pipeline_mode = #tpu.pipeline_mode<synchronous>, transform_indices = @transform_5, window_bounds = array<i64: 4, 1>}, {pipeline_mode = #tpu.pipeline_mode<synchronous>, transform_indices = @transform_6, window_bounds = array<i64: 1, 8>}, {pipeline_mode = #tpu.pipeline_mode<synchronous>, transform_indices = @transform_7, window_bounds = array<i64: 1, 8>}, {transform_indices = @transform_8, window_bounds = array<i64: 1, 4, 128>}]} {
    %c0_i32 = arith.constant 0 : i32
    %0 = arith.cmpi eq, %arg1, %c0_i32 : i32
    %c1_i32 = arith.constant 1 : i32
    %1 = arith.cmpi eq, %arg1, %c1_i32 : i32
    %c0 = arith.constant 0 : index
    %c0_0 = arith.constant 0 : index
    %2 = vector.load %arg8[%c0, %c0_0] : memref<1x8xf32, #tpu.memory_space<vmem>>, vector<1x8xf32>
    %c0_1 = arith.constant 0 : index
    %c0_2 = arith.constant 0 : index
    %3 = vector.load %arg9[%c0_1, %c0_2] : memref<1x8xf32, #tpu.memory_space<vmem>>, vector<1x8xf32>
    %cst = arith.constant 0.000000e+00 : f32
    %4 = vector.broadcast %cst : f32 to vector<12x1x8xf32>
    %c0_3 = arith.constant 0 : index
    %c0_4 = arith.constant 0 : index
    %c0_5 = arith.constant 0 : index
    %5 = vector.load %arg11[%c0_3, %c0_4, %c0_5] : memref<12x18x8xf32, #tpu.memory_space<vmem>>, vector<12x1x8xf32>
    tpu.vector_store %arg11[%c0_3, %c0_4, %c0_5], %4 {strides = array<i32>} : memref<12x18x8xf32, #tpu.memory_space<vmem>>, vector<12x1x8xf32>,
    %cst_6 = arith.constant 0.000000e+00 : f32
    %6 = vector.broadcast %cst_6 : f32 to vector<12x1x8xf32>
    %c0_7 = arith.constant 0 : index
    %c17 = arith.constant 17 : index
    %c0_8 = arith.constant 0 : index
    %7 = vector.load %arg11[%c0_7, %c17, %c0_8] : memref<12x18x8xf32, #tpu.memory_space<vmem>>, vector<12x1x8xf32>
    tpu.vector_store %arg11[%c0_7, %c17, %c0_8], %6 {strides = array<i32>} : memref<12x18x8xf32, #tpu.memory_space<vmem>>, vector<12x1x8xf32>,
    %c0_9 = arith.constant 0 : index
    %c0_10 = arith.constant 0 : index
    %c0_11 = arith.constant 0 : index
    %c0_12 = arith.constant 0 : index
    %c0_13 = arith.constant 0 : index
    %8 = vector.load %arg2[%c0_9, %c0_10, %c0_11, %c0_12, %c0_13] : memref<1x1x6x8x8xf32, #tpu.memory_space<vmem>>, vector<1x1x6x8x8xf32>
    %9 = vector.shape_cast %8 : vector<1x1x6x8x8xf32> to vector<6x8x8xf32>
    %10 = vector.shape_cast %9 : vector<6x8x8xf32> to vector<48x8xf32>
    %11 = vector.broadcast %2 : vector<1x8xf32> to vector<48x8xf32>
    %12 = arith.mulf %10, %11 : vector<48x8xf32>
    %13 = vector.broadcast %3 : vector<1x8xf32> to vector<48x8xf32>
    %14 = arith.addf %12, %13 : vector<48x8xf32>
    %cst_14 = arith.constant 0.000000e+00 : f32
    %15 = vector.broadcast %cst_14 : f32 to vector<48x8xf32>
    %16 = arith.maximumf %14, %15 : vector<48x8xf32>
    %17 = vector.shape_cast %16 : vector<48x8xf32> to vector<6x8x8xf32>
    %18 = vector.shape_cast %17 : vector<6x8x8xf32> to vector<6x8x1x8xf32>
    %19 = vector.shape_cast %18 : vector<6x8x1x8xf32> to vector<6x8x1x8xf32>
    %20 = vector.broadcast %19 : vector<6x8x1x8xf32> to vector<6x8x2x8xf32>
    %21 = vector.shape_cast %20 : vector<6x8x2x8xf32> to vector<6x16x8xf32>
    %22 = vector.shape_cast %21 : vector<6x16x8xf32> to vector<6x1x16x8xf32>
    %23 = vector.shape_cast %22 : vector<6x1x16x8xf32> to vector<6x1x16x8xf32>
    %24 = vector.broadcast %23 : vector<6x1x16x8xf32> to vector<6x2x16x8xf32>
    %25 = vector.shape_cast %24 : vector<6x2x16x8xf32> to vector<12x16x8xf32>
    %c0_15 = arith.constant 0 : index
    %c1 = arith.constant 1 : index
    %c0_16 = arith.constant 0 : index
    %26 = vector.load %arg11[%c0_15, %c1, %c0_16] : memref<12x18x8xf32, #tpu.memory_space<vmem>>, vector<12x16x8xf32>
    tpu.vector_store %arg11[%c0_15, %c1, %c0_16], %25 {strides = array<i32>} : memref<12x18x8xf32, #tpu.memory_space<vmem>>, vector<12x16x8xf32>,
    %27 = arith.extui %0 : i1 to i32
    %c0_i32_17 = arith.constant 0 : i32
    %28 = arith.cmpi ne, %27, %c0_i32_17 : i32
    scf.if %28 {
      %cst_70 = arith.constant 0.000000e+00 : f32
      %108 = vector.broadcast %cst_70 : f32 to vector<2x18x8xf32>
      %c0_71 = arith.constant 0 : index
      %c0_72 = arith.constant 0 : index
      %c0_73 = arith.constant 0 : index
      %109 = vector.load %arg11[%c0_71, %c0_72, %c0_73] : memref<12x18x8xf32, #tpu.memory_space<vmem>>, vector<2x18x8xf32>
      tpu.vector_store %arg11[%c0_71, %c0_72, %c0_73], %108 {strides = array<i32>} : memref<12x18x8xf32, #tpu.memory_space<vmem>>, vector<2x18x8xf32>,
    } else {
    }
    %29 = arith.extui %1 : i1 to i32
    %c0_i32_18 = arith.constant 0 : i32
    %30 = arith.cmpi ne, %29, %c0_i32_18 : i32
    scf.if %30 {
      %cst_70 = arith.constant 0.000000e+00 : f32
      %108 = vector.broadcast %cst_70 : f32 to vector<2x18x8xf32>
      %c10 = arith.constant 10 : index
      %c0_71 = arith.constant 0 : index
      %c0_72 = arith.constant 0 : index
      %109 = vector.load %arg11[%c10, %c0_71, %c0_72] : memref<12x18x8xf32, #tpu.memory_space<vmem>>, vector<2x18x8xf32>
      tpu.vector_store %arg11[%c10, %c0_71, %c0_72], %108 {strides = array<i32>} : memref<12x18x8xf32, #tpu.memory_space<vmem>>, vector<2x18x8xf32>,
    } else {
    }
    %c0_19 = arith.constant 0 : index
    %c0_20 = arith.constant 0 : index
    %c0_21 = arith.constant 0 : index
    %31 = vector.load %arg11[%c0_19, %c0_20, %c0_21] : memref<12x18x8xf32, #tpu.memory_space<vmem>>, vector<12x16x8xf32>
    %c0_22 = arith.constant 0 : index
    %c1_23 = arith.constant 1 : index
    %c0_24 = arith.constant 0 : index
    %32 = vector.load %arg11[%c0_22, %c1_23, %c0_24] : memref<12x18x8xf32, #tpu.memory_space<vmem>>, vector<12x16x8xf32>
    %c0_25 = arith.constant 0 : index
    %c2 = arith.constant 2 : index
    %c0_26 = arith.constant 0 : index
    %33 = vector.load %arg11[%c0_25, %c2, %c0_26] : memref<12x18x8xf32, #tpu.memory_space<vmem>>, vector<12x16x8xf32>
    %34 = tpu.concatenate %31, %32, %33 in 2 : vector<12x16x8xf32>, vector<12x16x8xf32>, vector<12x16x8xf32> -> vector<12x16x24xf32>
    %c0_27 = arith.constant 0 : index
    %c0_28 = arith.constant 0 : index
    %35 = vector.load %arg5[%c0_27, %c0_28] : memref<1x8xf32, #tpu.memory_space<vmem>>, vector<1x8xf32>
    %36 = vector.extract_strided_slice %34 {offsets = [0, 0, 0], sizes = [10, 16, 24], strides = [1, 1, 1]} : vector<12x16x24xf32> to vector<10x16x24xf32>
    %37 = vector.shape_cast %36 : vector<10x16x24xf32> to vector<160x24xf32>
    %c0_29 = arith.constant 0 : index
    %c0_30 = arith.constant 0 : index
    %c0_31 = arith.constant 0 : index
    %38 = vector.load %arg4[%c0_29, %c0_30, %c0_31] : memref<3x24x8xf32, #tpu.memory_space<vmem>>, vector<1x24x8xf32>
    %39 = vector.shape_cast %38 : vector<1x24x8xf32> to vector<24x8xf32>
    %cst_32 = arith.constant dense<0.000000e+00> : vector<160x8xf32>
    %40 = tpu.matmul %37, %39, %cst_32 {dimension_numbers = #tpu.dot_dimension_numbers<[1], [0], [0], [1], [0, 0, 1, 1], [], []>} : vector<160x24xf32>, vector<24x8xf32>, vector<160x8xf32> -> vector<160x8xf32>
    %41 = vector.broadcast %35 : vector<1x8xf32> to vector<160x8xf32>
    %42 = arith.addf %41, %40 : vector<160x8xf32>
    %43 = vector.extract_strided_slice %34 {offsets = [1, 0, 0], sizes = [10, 16, 24], strides = [1, 1, 1]} : vector<12x16x24xf32> to vector<10x16x24xf32>
    %44 = vector.shape_cast %43 : vector<10x16x24xf32> to vector<160x24xf32>
    %c1_33 = arith.constant 1 : index
    %c0_34 = arith.constant 0 : index
    %c0_35 = arith.constant 0 : index
    %45 = vector.load %arg4[%c1_33, %c0_34, %c0_35] : memref<3x24x8xf32, #tpu.memory_space<vmem>>, vector<1x24x8xf32>
    %46 = vector.shape_cast %45 : vector<1x24x8xf32> to vector<24x8xf32>
    %cst_36 = arith.constant dense<0.000000e+00> : vector<160x8xf32>
    %47 = tpu.matmul %44, %46, %cst_36 {dimension_numbers = #tpu.dot_dimension_numbers<[1], [0], [0], [1], [0, 0, 1, 1], [], []>} : vector<160x24xf32>, vector<24x8xf32>, vector<160x8xf32> -> vector<160x8xf32>
    %48 = arith.addf %42, %47 : vector<160x8xf32>
    %49 = vector.extract_strided_slice %34 {offsets = [2, 0, 0], sizes = [10, 16, 24], strides = [1, 1, 1]} : vector<12x16x24xf32> to vector<10x16x24xf32>
    %50 = vector.shape_cast %49 : vector<10x16x24xf32> to vector<160x24xf32>
    %c2_37 = arith.constant 2 : index
    %c0_38 = arith.constant 0 : index
    %c0_39 = arith.constant 0 : index
    %51 = vector.load %arg4[%c2_37, %c0_38, %c0_39] : memref<3x24x8xf32, #tpu.memory_space<vmem>>, vector<1x24x8xf32>
    %52 = vector.shape_cast %51 : vector<1x24x8xf32> to vector<24x8xf32>
    %cst_40 = arith.constant dense<0.000000e+00> : vector<160x8xf32>
    %53 = tpu.matmul %50, %52, %cst_40 {dimension_numbers = #tpu.dot_dimension_numbers<[1], [0], [0], [1], [0, 0, 1, 1], [], []>} : vector<160x24xf32>, vector<24x8xf32>, vector<160x8xf32> -> vector<160x8xf32>
    %54 = arith.addf %48, %53 : vector<160x8xf32>
    %55 = vector.broadcast %2 : vector<1x8xf32> to vector<160x8xf32>
    %56 = arith.mulf %54, %55 : vector<160x8xf32>
    %57 = vector.broadcast %3 : vector<1x8xf32> to vector<160x8xf32>
    %58 = arith.addf %56, %57 : vector<160x8xf32>
    %cst_41 = arith.constant 0.000000e+00 : f32
    %59 = vector.broadcast %cst_41 : f32 to vector<160x8xf32>
    %60 = arith.maximumf %58, %59 : vector<160x8xf32>
    %61 = vector.shape_cast %60 : vector<160x8xf32> to vector<10x16x8xf32>
    %c0_42 = arith.constant 0 : index
    %c1_43 = arith.constant 1 : index
    %c0_44 = arith.constant 0 : index
    %62 = vector.load %arg11[%c0_42, %c1_43, %c0_44] : memref<12x18x8xf32, #tpu.memory_space<vmem>>, vector<10x16x8xf32>
    tpu.vector_store %arg11[%c0_42, %c1_43, %c0_44], %61 {strides = array<i32>} : memref<12x18x8xf32, #tpu.memory_space<vmem>>, vector<10x16x8xf32>,
    %63 = arith.extui %0 : i1 to i32
    %c0_i32_45 = arith.constant 0 : i32
    %64 = arith.cmpi ne, %63, %c0_i32_45 : i32
    scf.if %64 {
      %cst_70 = arith.constant 0.000000e+00 : f32
      %108 = vector.broadcast %cst_70 : f32 to vector<1x18x8xf32>
      %c0_71 = arith.constant 0 : index
      %c0_72 = arith.constant 0 : index
      %c0_73 = arith.constant 0 : index
      %109 = vector.load %arg11[%c0_71, %c0_72, %c0_73] : memref<12x18x8xf32, #tpu.memory_space<vmem>>, vector<1x18x8xf32>
      tpu.vector_store %arg11[%c0_71, %c0_72, %c0_73], %108 {strides = array<i32>} : memref<12x18x8xf32, #tpu.memory_space<vmem>>, vector<1x18x8xf32>,
    } else {
    }
    %65 = arith.extui %1 : i1 to i32
    %c0_i32_46 = arith.constant 0 : i32
    %66 = arith.cmpi ne, %65, %c0_i32_46 : i32
    scf.if %66 {
      %cst_70 = arith.constant 0.000000e+00 : f32
      %108 = vector.broadcast %cst_70 : f32 to vector<1x18x8xf32>
      %c9 = arith.constant 9 : index
      %c0_71 = arith.constant 0 : index
      %c0_72 = arith.constant 0 : index
      %109 = vector.load %arg11[%c9, %c0_71, %c0_72] : memref<12x18x8xf32, #tpu.memory_space<vmem>>, vector<1x18x8xf32>
      tpu.vector_store %arg11[%c9, %c0_71, %c0_72], %108 {strides = array<i32>} : memref<12x18x8xf32, #tpu.memory_space<vmem>>, vector<1x18x8xf32>,
    } else {
    }
    %c0_47 = arith.constant 0 : index
    %c0_48 = arith.constant 0 : index
    %c0_49 = arith.constant 0 : index
    %67 = vector.load %arg11[%c0_47, %c0_48, %c0_49] : memref<12x18x8xf32, #tpu.memory_space<vmem>>, vector<10x18x8xf32>
    %68 = vector.extract_strided_slice %67 {offsets = [0, 0, 0], sizes = [10, 16, 8], strides = [1, 1, 1]} : vector<10x18x8xf32> to vector<10x16x8xf32>
    %69 = vector.extract_strided_slice %67 {offsets = [0, 1, 0], sizes = [10, 16, 8], strides = [1, 1, 1]} : vector<10x18x8xf32> to vector<10x16x8xf32>
    %70 = vector.extract_strided_slice %67 {offsets = [0, 2, 0], sizes = [10, 16, 8], strides = [1, 1, 1]} : vector<10x18x8xf32> to vector<10x16x8xf32>
    %71 = tpu.concatenate %68, %69, %70 in 2 : vector<10x16x8xf32>, vector<10x16x8xf32>, vector<10x16x8xf32> -> vector<10x16x24xf32>
    %c0_50 = arith.constant 0 : index
    %c0_51 = arith.constant 0 : index
    %72 = vector.load %arg7[%c0_50, %c0_51] : memref<4x1xf32, #tpu.memory_space<vmem>>, vector<4x1xf32>
    %73 = vector.extract_strided_slice %71 {offsets = [0, 0, 0], sizes = [8, 16, 24], strides = [1, 1, 1]} : vector<10x16x24xf32> to vector<8x16x24xf32>
    %74 = vector.shape_cast %73 : vector<8x16x24xf32> to vector<128x24xf32>
    %c0_52 = arith.constant 0 : index
    %c0_53 = arith.constant 0 : index
    %c0_54 = arith.constant 0 : index
    %75 = vector.load %arg6[%c0_52, %c0_53, %c0_54] : memref<3x4x24xf32, #tpu.memory_space<vmem>>, vector<1x4x24xf32>
    %76 = vector.shape_cast %75 : vector<1x4x24xf32> to vector<4x24xf32>
    %cst_55 = arith.constant dense<0.000000e+00> : vector<4x128xf32>
    %77 = tpu.matmul %76, %74, %cst_55 {dimension_numbers = #tpu.dot_dimension_numbers<[1], [1], [0], [0], [0, 0, 1, 0], [], []>} : vector<4x24xf32>, vector<128x24xf32>, vector<4x128xf32> -> vector<4x128xf32>
    %78 = vector.broadcast %72 : vector<4x1xf32> to vector<4x128xf32>
    %79 = arith.addf %78, %77 : vector<4x128xf32>
    %80 = vector.extract_strided_slice %71 {offsets = [1, 0, 0], sizes = [8, 16, 24], strides = [1, 1, 1]} : vector<10x16x24xf32> to vector<8x16x24xf32>
    %81 = vector.shape_cast %80 : vector<8x16x24xf32> to vector<128x24xf32>
    %c1_56 = arith.constant 1 : index
    %c0_57 = arith.constant 0 : index
    %c0_58 = arith.constant 0 : index
    %82 = vector.load %arg6[%c1_56, %c0_57, %c0_58] : memref<3x4x24xf32, #tpu.memory_space<vmem>>, vector<1x4x24xf32>
    %83 = vector.shape_cast %82 : vector<1x4x24xf32> to vector<4x24xf32>
    %cst_59 = arith.constant dense<0.000000e+00> : vector<4x128xf32>
    %84 = tpu.matmul %83, %81, %cst_59 {dimension_numbers = #tpu.dot_dimension_numbers<[1], [1], [0], [0], [0, 0, 1, 0], [], []>} : vector<4x24xf32>, vector<128x24xf32>, vector<4x128xf32> -> vector<4x128xf32>
    %85 = arith.addf %79, %84 : vector<4x128xf32>
    %86 = vector.extract_strided_slice %71 {offsets = [2, 0, 0], sizes = [8, 16, 24], strides = [1, 1, 1]} : vector<10x16x24xf32> to vector<8x16x24xf32>
    %87 = vector.shape_cast %86 : vector<8x16x24xf32> to vector<128x24xf32>
    %c2_60 = arith.constant 2 : index
    %c0_61 = arith.constant 0 : index
    %c0_62 = arith.constant 0 : index
    %88 = vector.load %arg6[%c2_60, %c0_61, %c0_62] : memref<3x4x24xf32, #tpu.memory_space<vmem>>, vector<1x4x24xf32>
    %89 = vector.shape_cast %88 : vector<1x4x24xf32> to vector<4x24xf32>
    %cst_63 = arith.constant dense<0.000000e+00> : vector<4x128xf32>
    %90 = tpu.matmul %89, %87, %cst_63 {dimension_numbers = #tpu.dot_dimension_numbers<[1], [1], [0], [0], [0, 0, 1, 0], [], []>} : vector<4x24xf32>, vector<128x24xf32>, vector<4x128xf32> -> vector<4x128xf32>
    %91 = arith.addf %85, %90 : vector<4x128xf32>
    %92 = vector.extract_strided_slice %9 {offsets = [1, 0, 0], sizes = [4, 8, 8], strides = [1, 1, 1]} : vector<6x8x8xf32> to vector<4x8x8xf32>
    %93 = vector.shape_cast %92 : vector<4x8x8xf32> to vector<4x8x1x8xf32>
    %94 = vector.shape_cast %93 : vector<4x8x1x8xf32> to vector<4x8x1x8xf32>
    %95 = vector.broadcast %94 : vector<4x8x1x8xf32> to vector<4x8x2x8xf32>
    %96 = vector.shape_cast %95 : vector<4x8x2x8xf32> to vector<4x16x8xf32>
    %97 = vector.shape_cast %96 : vector<4x16x8xf32> to vector<4x1x16x8xf32>
    %98 = vector.shape_cast %97 : vector<4x1x16x8xf32> to vector<4x1x16x8xf32>
    %99 = vector.broadcast %98 : vector<4x1x16x8xf32> to vector<4x2x16x8xf32>
    %100 = vector.shape_cast %99 : vector<4x2x16x8xf32> to vector<8x16x8xf32>
    %c0_64 = arith.constant 0 : index
    %c0_65 = arith.constant 0 : index
    %101 = vector.load %arg3[%c0_64, %c0_65] : memref<4x8xf32, #tpu.memory_space<vmem>>, vector<4x8xf32>
    %102 = vector.shape_cast %100 : vector<8x16x8xf32> to vector<128x8xf32>
    %cst_66 = arith.constant dense<0.000000e+00> : vector<4x128xf32>
    %103 = tpu.matmul %101, %102, %cst_66 {dimension_numbers = #tpu.dot_dimension_numbers<[1], [1], [0], [0], [0, 0, 1, 0], [], []>} : vector<4x8xf32>, vector<128x8xf32>, vector<4x128xf32> -> vector<4x128xf32>
    %104 = arith.addf %91, %103 : vector<4x128xf32>
    %c0_67 = arith.constant 0 : index
    %c0_68 = arith.constant 0 : index
    %c0_69 = arith.constant 0 : index
    %105 = vector.load %arg10[%c0_67, %c0_68, %c0_69] : memref<1x4x128xf32, #tpu.memory_space<vmem>>, vector<1x4x128xf32>
    %106 = vector.shape_cast %105 : vector<1x4x128xf32> to vector<4x128xf32>
    %107 = vector.shape_cast %104 : vector<4x128xf32> to vector<1x4x128xf32>
    tpu.vector_store %arg10[%c0_67, %c0_68, %c0_69], %107 {strides = array<i32>} : memref<1x4x128xf32, #tpu.memory_space<vmem>>, vector<1x4x128xf32>,
    return
  }
  func.func @transform_0(%arg0: i32, %arg1: i32) -> (i32, i32, i32, i32, i32) {
    %c0_i32 = arith.constant 0 : i32
    %c0_i32_0 = arith.constant 0 : i32
    %c0_i32_1 = arith.constant 0 : i32
    %c0_i32_2 = arith.constant 0 : i32
    return %arg0, %arg1, %c0_i32, %c0_i32_0, %c0_i32_1 : i32, i32, i32, i32, i32
  }
  func.func @transform_1(%arg0: i32, %arg1: i32) -> (i32, i32) {
    %c0_i32 = arith.constant 0 : i32
    %c0_i32_0 = arith.constant 0 : i32
    %c0_i32_1 = arith.constant 0 : i32
    return %c0_i32, %c0_i32_0 : i32, i32
  }
  func.func @transform_2(%arg0: i32, %arg1: i32) -> (i32, i32, i32) {
    %c0_i32 = arith.constant 0 : i32
    %c0_i32_0 = arith.constant 0 : i32
    %c0_i32_1 = arith.constant 0 : i32
    %c0_i32_2 = arith.constant 0 : i32
    return %c0_i32, %c0_i32_0, %c0_i32_1 : i32, i32, i32
  }
  func.func @transform_3(%arg0: i32, %arg1: i32) -> (i32, i32) {
    %c0_i32 = arith.constant 0 : i32
    %c0_i32_0 = arith.constant 0 : i32
    %c0_i32_1 = arith.constant 0 : i32
    return %c0_i32, %c0_i32_0 : i32, i32
  }
  func.func @transform_4(%arg0: i32, %arg1: i32) -> (i32, i32, i32) {
    %c0_i32 = arith.constant 0 : i32
    %c0_i32_0 = arith.constant 0 : i32
    %c0_i32_1 = arith.constant 0 : i32
    %c0_i32_2 = arith.constant 0 : i32
    return %c0_i32, %c0_i32_0, %c0_i32_1 : i32, i32, i32
  }
  func.func @transform_5(%arg0: i32, %arg1: i32) -> (i32, i32) {
    %c0_i32 = arith.constant 0 : i32
    %c0_i32_0 = arith.constant 0 : i32
    %c0_i32_1 = arith.constant 0 : i32
    return %c0_i32, %c0_i32_0 : i32, i32
  }
  func.func @transform_6(%arg0: i32, %arg1: i32) -> (i32, i32) {
    %c0_i32 = arith.constant 0 : i32
    %c0_i32_0 = arith.constant 0 : i32
    %c0_i32_1 = arith.constant 0 : i32
    return %c0_i32, %c0_i32_0 : i32, i32
  }
  func.func @transform_7(%arg0: i32, %arg1: i32) -> (i32, i32) {
    %c0_i32 = arith.constant 0 : i32
    %c0_i32_0 = arith.constant 0 : i32
    %c0_i32_1 = arith.constant 0 : i32
    return %c0_i32, %c0_i32_0 : i32, i32
  }
  func.func @transform_8(%arg0: i32, %arg1: i32) -> (i32, i32, i32) {
    %c0_i32 = arith.constant 0 : i32
    %c0_i32_0 = arith.constant 0 : i32
    return %arg0, %c0_i32, %arg1 : i32, i32, i32
  }
}

</mosaic_0001>

<bundles_post_ra>
// kernel: tpu_custom_call.1
= control target key start
LH: loop header
LB: loop body
LE: loop exit
PB: predicated region body
PF: predicated region fallthrough
CT: control target
= control target key end

     0   :  { %s5634_s0 = inlined_call_operand.hbm [shape: f32[2,2,6,8,8], index: 0, kind: input, shape index: {}]   ;;  %s5635_s1 = inlined_call_operand.vmem [shape: f32[4,8], index: 1, kind: input, shape index: {}]   ;;  %s5636_s2 = inlined_call_operand.vmem [shape: f32[3,24,8], index: 2, kind: input, shape index: {}]   ;;  %s5637_s3 = inlined_call_operand.vmem [shape: f32[1,8], index: 3, kind: input, shape index: {}]   ;;  %s5638_s4 = inlined_call_operand.vmem [shape: f32[3,4,24], index: 4, kind: input, shape index: {}]   ;;  %s5639_s5 = inlined_call_operand.vmem [shape: f32[4,1], index: 5, kind: input, shape index: {}]   ;;  %s5640_s6 = inlined_call_operand.vmem [shape: f32[1,8], index: 6, kind: input, shape index: {}]   ;;  %s5641_s7 = inlined_call_operand.vmem [shape: f32[1,8], index: 7, kind: input, shape index: {}]   ;;  %s5642_s8 = inlined_call_operand.hbm [shape: f32[2,4,256], index: 8, kind: output, shape index: {}]  }
   0x1   :  { %5652 = sst [smem:[#allocation17_spill]] %s5642_s8 }
   0x2   :  { %13 = vsyncpa [#allocation4], 0 }
   0x3   :  { %15 = vsyncpa [#allocation4 + $0x1], 0 }
   0x4   :  { %16 = vsyncpa [#allocation5], 0 }
   0x5   :  { %18 = vsyncpa [#allocation5 + $0x1], 0  ;;  %s4316_s27 = smov 0   ;;  %s4318_s28 = smov 0  }
   0x6   :  { %s4320_s29 = smov 0   ;;  %s4322_s30 = smov 0  }
   0x7   :  { %s4324_s9 = smov 0   ;;  %s4326_s10 = smov 0  }
   0x8   :  { %s4328_s11 = smov 0   ;;  %s4330_s12 = smov 0  }
   0x9 LB: > { %5653 = sst [smem:[#allocation9_spill]] %s4226_s27  ;;  %s3488_s13 = sadd.s32 4294967295, %s4254_s12   ;;  %s4254_s12 = sphi %s4330_s12, %s24_s12   ;;  %s4250_s11 = sphi %s4328_s11, %s5674_s11   ;;  %s4246_s10 = sphi %s4326_s10, %s5673_s10   ;;  %s4242_s9 = sphi %s4324_s9, %s5672_s9   ;;  %s4238_s30 = sphi %s4322_s30, %s5671_s30   ;;  %s4234_s29 = sphi %s4320_s29, %s5677_s29   ;;  %s4230_s28 = sphi %s4318_s28, %s5676_s28   ;;  %s4226_s27 = sphi %s4316_s27, %s5675_s27  }
   0xa   : > { %5654 = sst [smem:[#allocation10_spill]] %s4246_s10  ;;  %s3489_s14 = sadd.s32 4294967294, %s4254_s12  }
   0xb   : > { %5655 = sst [smem:[#allocation11_spill]] %s4250_s11  ;;  %s33_s15 = sadd.s32 1, %s4246_s10 }
   0xc   : > { %s36_s16 = sadd.s32 1, %s4250_s11  ;;  %p34_p0 = scmp.ge.s32.totalorder %s33_s15, 2 }
   0xd   : > { %s45_s17 = sadd.s32 1, %s4234_s29  ;;  %p52_p1 = scmp.ne.s32.totalorder %s4234_s29, %s4230_s28 }
   0xe   : > { %p53_p2 = scmp.eq.s32.totalorder %s4254_s12, 0  ;;  %s5679_s15 = smov (%p34_p0, %s33_s15), 0 }
   0xf   : > { %5656 = sst [smem:[#allocation12_spill]] %s5679_s15  ;;  %s5681_s16 = smov (!%p34_p0, %s36_s16), %s4250_s11 }
  0x10   : > { %s41_s18 = ssub.s32 %s4246_s10, %s5679_s15  ;;  %p4369_p3 = por %p53_p2, %p52_p1 }
  0x11   : > { %p38_p4 = scmp.ge.s32.totalorder %s5681_s16, 2  ;;  %p58_p5 = scmp.ne.s32.totalorder %s4230_s28, %s4226_s27 }
  0x12   : > { %p59_p6 = scmp.eq.s32.totalorder %s3488_s13, 0  ;;  %p231_p7 = scmp.eq.s32.totalorder %s3488_s13, 3 }
  0x13   : > { %s5683_s16 = smov (%p38_p4, %s5681_s16), 0  ;;  %p237_p10 = scmp.eq.s32.totalorder %s3489_s14, 3 }
  0x14   : > { %5658 = sst [smem:[#allocation13_spill]] %s5683_s16  ;;  %p4377_p8 = por %p59_p6, %p58_p5 }
  0x15   : > { %p4381_p9 = por %p231_p7, %p52_p1  ;;  %s40_s22 = ssub.s32 %s4250_s11, %s5683_s16 }
  0x16   : > { %s42_s23 = sor.u32 %s41_s18, %s40_s22  ;;  %p4387_p12 = por %p237_p10, %p58_p5 }
  0x17   : > { %s5660_s21 = scalar_select %p4381_p9, 1, 0 }
  0x18   : > { %p43_p11 = scmp.eq.s32.totalorder %s42_s23, 0  ;;  %p4050_p13 = scmp.lt.s32.totalorder %s4254_s12, 4 }
  0x19   : > { %5661 = sst [smem:[#allocation14_spill]] %s5660_s21  ;;  %s278_s25 = sand.u32 1, %s4234_s29  }
  0x1a   : > { %s5662_s24 = scalar_select %p4387_p12, 1, 0 }
  0x1b   : > { %s4394_s26 = scalar_select %p43_p11, %s4234_s29, %s45_s17  }
  0x1c   : > { %5663 = sst [smem:[#allocation15_spill]] %s5662_s24  ;;  %s4034_s13 = smul.u32 48, %s278_s25 }
  0x1d   : > { %5664 = sst [smem:[#allocation16_spill]] %s4394_s26  ;;  %s4035_s15 = smul.u32 6, %s4246_s10 }
  0x1e   : > { %p4399_p0 = pnand %p4050_p13, %p4369_p3  ;;  %s4036_s16 = smul.u32 12, %s4250_s11 }
  0x1f   : > { %s282_s14 = scalar_lea.vmem [#allocation3], %s4034_s13  ;;  %s279_s17 = scalar_lea.sflag [#allocation4], %s278_s25 }
  0x20   : > { %s291_s18 = sshll.u32 %s282_s14, 4  ;;  %s288_s22 = sadd.s32 %s4036_s16, %s4035_s15  ;;  %s292_s18 = int_to_ptr.vmem [resolvable:$true] %s291_s18 }
  0x21   : > { %s3492_s23 = sshll.u32 %s288_s22, 7  ;;  %p4132_p1 = pneg %p4399_p0 }
  0x22   : > { %s290_s21 = scalar_lea.hbm %s5634_s0, %s3492_s23  ;;  %s4143_s10 = scalar_lea.vmem %s292_s18, 768 }
  0x23   : > { %p4144_p2 = scmp.ne.s32.totalorder %s292_s18, %s4143_s10  ;;  %s4256_s19 = smov [#allocation3]  }
  0x24   : > { %s4148_s26 = sshll.u32 %s4256_s19, 4  ;;  %s4149_s26 = int_to_ptr.vmem [resolvable:$false] %s4148_s26 }
  0x25   : > { %p4146_p3 = pnand %p4144_p2, %p4132_p1  ;;  %s4150_s11 = scalar_lea.vmem %s4149_s26, 1536 }
  0x26   : > { %p4151_p5 = scmp.lt.s32.totalorder %s292_s18, %s4149_s26  ;;  %p4152_p6 = scmp.lt.s32.totalorder %s4150_s11, %s4143_s10 }
  0x27   : > { %p4147_p4 = pneg %p4146_p3 }
  0x28   : > { %p4153_p7 = por %p4152_p6, %p4151_p5 }
  0x2a   : > { %p4154_p10 = pnand %p4153_p7, %p4147_p4 }
  0x2c   : > { %4157 = shalt.err (!%p4154_p10)
}
  0x2d   : > { %s4257_s15 = smov 128   ;;  %s4258_s8 = smov 8  }
  0x2e   : > { %4045 = dma.hbm_to_vmem [thread:$0]  (!%p4399_p0), %s290_s21, 768, %s292_s18, %s279_s17, %s4257_s15, %s4257_s15, %s4258_s8  }
  0x2f   : > { %p3493_p11 = scmp.ge.s32.totalorder %s4254_s12, 1  ;;  %p299_p13 = scmp.lt.s32.totalorder %s4254_s12, 5 }
  0x31   : > { %p300_p1 = pnand %p3493_p11, %p299_p13 }
  0x32   : > { %s4414_s16 = sand.u32 (!%p300_p1), 1, %s4230_s28  }
  0x33   : > { %303 = sbr.rel (%p300_p1) target bundleno = 1059 (0x423), region = 52  ;;  %s306_s11 = scalar_lea.sflag (!%p300_p1), [#allocation4], %s4414_s16 }
  0x34   : > { %s4037_s10 = smul.u32 (!%p300_p1), 48, %s4414_s16 }
  0x36   : > { %s4418_s24 = scalar_lea.vmem (!%p300_p1), [#allocation3], %s4037_s10 }
  0x38   : > { %4217 = dma.done.wait (%p4377_p8), %s306_s11, 768  }
  0x39   : > { %4219 = vsyncadd (%p4377_p8), %s306_s11, 4294966528  ;;  %s3494_s27 = sshll.u32 %s4414_s16, 2  ;;  %vm346_vm0 = vcmask 57344   ;;  %v4259_v0 = vmov 0.0   ;;  %v4260_v1 = vmov 1966171168   ;;  %v417_v3 = vlaneseq }
  0x3a   : > { %347 = vst.msk [vmem:[#allocation2] sm:$0x1] %vm346_vm0, %v4259_v0  ;;  %348 = vst.msk [vmem:[#allocation2 + $0x18] sm:$0x1] %vm346_vm0, %v4259_v0  ;;  %v415_v2 = vunpack.c.l.s4 %v4260_v1  ;;  %v4261_v4 = vmov 1983009808  }
  0x3b   : > { %349 = vst.msk [vmem:[#allocation2 + $0x30] sm:$0x1] %vm346_vm0, %v4259_v0  ;;  %350 = vst.msk [vmem:[#allocation2 + $0x48] sm:$0x1] %vm346_vm0, %v4259_v0  ;;  %v902_v5 = vunpack.c.l.s4 %v4261_v4  ;;  %v418_v7 = vshrl.u32 %v417_v3, 7  ;;  %v371_v10 = vld [vmem:[%s4418_s24] sm:$0xff] }
  0x3c   : > { %351 = vst.msk [vmem:[#allocation2 + $0x60] sm:$0x1] %vm346_vm0, %v4259_v0  ;;  %352 = vst.msk [vmem:[#allocation2 + $0x78] sm:$0x1] %vm346_vm0, %v4259_v0  ;;  %v416_v6 = vunpack.c.0.s8 %v415_v2  ;;  %v4476_v8 = vld [vmem:[%s5640_s6] ss:$0 sm:$0xff] }
  0x3d   : > { %353 = vst.msk [vmem:[#allocation2 + $0x90] sm:$0x1] %vm346_vm0, %v4259_v0  ;;  %354 = vst.msk [vmem:[#allocation2 + $0xa8] sm:$0x1] %vm346_vm0, %v4259_v0  ;;  %v4481_v9 = vld [vmem:[%s5641_s7] ss:$0 sm:$0xff]  ;;  %v383_v11 = vmul.f32 %v4476_v8, %v371_v10  ;;  %v903_v15 = vunpack.c.0.s8 %v902_v5 }
  0x3e   : > { %355 = vst.msk [vmem:[#allocation2 + $0xc0] sm:$0x1] %vm346_vm0, %v4259_v0  ;;  %356 = vst.msk [vmem:[#allocation2 + $0xd8] sm:$0x1] %vm346_vm0, %v4259_v0  ;;  %v4486_v12 = vld [vmem:[%s4418_s24 + $0x8] sm:$0xff]  ;;  %v4489_v13 = vld [vmem:[%s4418_s24 + $0x10] sm:$0xff]  ;;  %v4505_v22 = vsub.s32 %v416_v6, %v418_v7 }
  0x3f   : > { %357 = vst.msk [vmem:[#allocation2 + $0xf0] sm:$0x1] %vm346_vm0, %v4259_v0  ;;  %358 = vst.msk [vmem:[#allocation2 + $0x108] sm:$0x1] %vm346_vm0, %v4259_v0  ;;  %v4492_v14 = vld [vmem:[%s4418_s24 + $0x18] sm:$0xff]  ;;  %v384_v16 = vmul.f32 %v4476_v8, %v4486_v12  ;;  %v385_v17 = vmul.f32 %v4476_v8, %v4489_v13  ;;  %v4501_v19 = vld [vmem:[%s4418_s24 + $0x20] sm:$0xff]  ;;  %v395_v21 = vadd.f32 %v4481_v9, %v383_v11 }
  0x40   : > { %359 = vst.msk [vmem:[#allocation2 + $0x11] sm:$0x1] %vm346_vm0, %v4259_v0  ;;  %360 = vst.msk [vmem:[#allocation2 + $0x29] sm:$0x1] %vm346_vm0, %v4259_v0  ;;  %v386_v18 = vmul.f32 %v4476_v8, %v4492_v14  ;;  %v376_v20 = vld [vmem:[%s4418_s24 + $0x28] sm:$0xff]  ;;  %v387_v23 = vmul.f32 %v4476_v8, %v4501_v19  ;;  %v4513_v29 = vsub.s32 0, %v418_v7  ;;  %v4517_v32 = vsub.s32 %v903_v15, %v418_v7 }
  0x41   : > { %361 = vst.msk [vmem:[#allocation2 + $0x41] sm:$0x1] %vm346_vm0, %v4259_v0  ;;  %362 = vst.msk [vmem:[#allocation2 + $0x59] sm:$0x1] %vm346_vm0, %v4259_v0  ;;  %v388_v24 = vmul.f32 %v4476_v8, %v376_v20  ;;  %v396_v25 = vadd.f32 %v4481_v9, %v384_v16  ;;  %v397_v26 = vadd.f32 %v4481_v9, %v385_v17  ;;  %v401_v28 = vmax.f32 %v395_v21, 0.0  ;;  %s4681_s13 = scalar_lea.vmem [#allocation6], %s3494_s27 }
  0x42   : > { %363 = vst.msk [vmem:[#allocation2 + $0x71] sm:$0x1] %vm346_vm0, %v4259_v0  ;;  %364 = vst.msk [vmem:[#allocation2 + $0x89] sm:$0x1] %vm346_vm0, %v4259_v0  ;;  %v398_v27 = vadd.f32 %v4481_v9, %v386_v18  ;;  %v399_v30 = vadd.f32 %v4481_v9, %v387_v23  ;;  %vm1115_vm1 = vcmask 64512   ;;  %p3497_p8 = scmp.ne.s32.totalorder %s4238_s30, 0 }
  0x43   : > { %365 = vst.msk [vmem:[#allocation2 + $0xa1] sm:$0x1] %vm346_vm0, %v4259_v0  ;;  %366 = vst.msk [vmem:[#allocation2 + $0xb9] sm:$0x1] %vm346_vm0, %v4259_v0  ;;  %v400_v31 = vadd.f32 %v4481_v9, %v388_v24  ;;  %v402_v33 = vmax.f32 %v396_v25, 0.0  ;;  %v4519_v34 = vmax.f32 %v397_v26, 0.0  ;;  %v420_v36 = vrot.slane %v401_v28, %v4505_v22 }
  0x44   : > { %367 = vst.msk [vmem:[#allocation2 + $0xd1] sm:$0x1] %vm346_vm0, %v4259_v0  ;;  %368 = vst.msk [vmem:[#allocation2 + $0xe9] sm:$0x1] %vm346_vm0, %v4259_v0  ;;  %v4521_v35 = vmax.f32 %v398_v27, 0.0  ;;  %v413_v37 = vcombine.high %v401_v28, %v401_v28  ;;  %v4524_v38 = vmax.f32 %v399_v30, 0.0 }
  0x45   : > { %369 = vst.msk [vmem:[#allocation2 + $0x101] sm:$0x1] %vm346_vm0, %v4259_v0  ;;  %370 = vst.msk [vmem:[#allocation2 + $0x119] sm:$0x1] %vm346_vm0, %v4259_v0  ;;  %v4526_v39 = vmax.f32 %v400_v31, 0.0  ;;  %v469_v40 = vrot.slane %v402_v33, %v4505_v22  ;;  %v462_v41 = vcombine.high %v402_v33, %v402_v33  ;;  %v518_v42 = vrot.slane %v4519_v34, %v4505_v22 }
  0x46   : > { %v511_v43 = vcombine.high %v4519_v34, %v4519_v34  ;;  %v428_v44 = vcombine.high %v420_v36, %v420_v36  ;;  %v436_v45 = vrot.slane %v420_v36, %v4505_v22  ;;  %v427_v46 = vrot.slane %v413_v37, %v4505_v22 }
  0x47   : > { %v4537_v47 = vrot.slane %v4521_v35, %v4505_v22  ;;  %v477_v48 = vcombine.high %v469_v40, %v469_v40  ;;  %v485_v49 = vrot.slane %v469_v40, %v4505_v22  ;;  %v476_v50 = vrot.slane %v462_v41, %v4505_v22 }
  0x48   : > { %v526_v51 = vcombine.high %v518_v42, %v518_v42  ;;  %v450_v52 = vrot.slane %v428_v44, %v4505_v22  ;;  %v458_v53 = vcombine.high %v436_v45, %v436_v45  ;;  %v710_v54 = vrot.slane %v436_v45, %v4513_v29 }
  0x49   : > { %v429_v55 = vcombine.high %v427_v46, %v427_v46  ;;  %v443_v56 = vrot.slane %v427_v46, %v4505_v22  ;;  %v499_v57 = vrot.slane %v477_v48, %v4505_v22  ;;  %v507_v58 = vcombine.high %v485_v49, %v485_v49 }
  0x4a   : > { %v742_v59 = vrot.slane %v485_v49, %v4513_v29  ;;  %v460_v60 = vcombine.high %v450_v52, %v450_v52  ;;  %v714_v61 = vrot.slane %v450_v52, %v4513_v29  ;;  %v718_v62 = vrot.slane %v458_v53, %v4513_v29 }
  0x4b   : > { %v457_v63 = vrot.slane %v429_v55, %v4505_v22  ;;  %v459_v1 = vcombine.high %v443_v56, %v443_v56  ;;  %v726_v2 = vrot.slane %v443_v56, %v4513_v29  ;;  %v509_v3 = vcombine.high %v499_v57, %v499_v57 }
  0x4c   : > { %v746_v4 = vrot.slane %v499_v57, %v4513_v29  ;;  %v722_v5 = vrot.slane %v460_v60, %v4513_v29  ;;  %v899_v6 = vcombine.low %v710_v54, %v714_v61  ;;  %v750_v15 = vrot.slane %v507_v58, %v4513_v29 }
  0x4d   : > { %v461_v7 = vcombine.high %v457_v63, %v457_v63  ;;  %v730_v10 = vrot.slane %v457_v63, %v4513_v29  ;;  %v734_v11 = vrot.slane %v459_v1, %v4513_v29  ;;  %v754_v16 = vrot.slane %v509_v3, %v4513_v29 }
  0x4e   : > { %v933_v17 = vcombine.low %v742_v59, %v746_v4  ;;  %v900_v18 = vcombine.low %v718_v62, %v722_v5  ;;  %v907_v20 = vrot.slane %v899_v6, %v4517_v32  ;;  %v478_v26 = vcombine.high %v476_v50, %v476_v50 }
  0x4f   : > { %v738_v21 = vrot.slane %v461_v7, %v4513_v29  ;;  %v916_v23 = vcombine.low %v726_v2, %v730_v10  ;;  %v934_v24 = vcombine.low %v750_v15, %v754_v16  ;;  %v492_v27 = vrot.slane %v476_v50, %v4505_v22 }
  0x50   : > { %v941_v25 = vrot.slane %v933_v17, %v4517_v32  ;;  %v914_v28 = vrot.slane %v900_v18, %v4517_v32  ;;  %v534_v33 = vrot.slane %v518_v42, %v4505_v22  ;;  %v506_v37 = vrot.slane %v478_v26, %v4505_v22 }
  0x51   : > { %v917_v30 = vcombine.low %v734_v11, %v738_v21  ;;  %v924_v31 = vrot.slane %v916_v23, %v4517_v32  ;;  %v948_v36 = vrot.slane %v934_v24, %v4517_v32  ;;  %v508_v40 = vcombine.high %v492_v27, %v492_v27 }
  0x52   : > { %v758_v41 = vrot.slane %v492_v27, %v4513_v29  ;;  %v915_v44 = vcombine.low %v907_v20, %v914_v28  ;;  %v548_v46 = vrot.slane %v526_v51, %v4505_v22  ;;  %v556_v48 = vcombine.high %v534_v33, %v534_v33 }
  0x53   : > { %v931_v45 = vrot.slane %v917_v30, %v4517_v32  ;;  %v949_v49 = vcombine.low %v941_v25, %v948_v36  ;;  %v510_v50 = vcombine.high %v506_v37, %v506_v37  ;;  %v762_v52 = vrot.slane %v506_v37, %v4513_v29 }
  0x54   : > { %v766_v53 = vrot.slane %v508_v40, %v4513_v29  ;;  %1116 = vst.msk [vmem:[#allocation2 + $0x1] sm:$0xff] %vm1115_vm1, %v915_v44  ;;  %1118 = vst.msk [vmem:[#allocation2 + $0x19] sm:$0xff] %vm1115_vm1, %v915_v44  ;;  %v558_v54 = vcombine.high %v548_v46, %v548_v46  ;;  %v774_v55 = vrot.slane %v534_v33, %v4513_v29 }
  0x55   : > { %v932_v42 = vcombine.low %v924_v31, %v931_v45  ;;  %v778_v56 = vrot.slane %v548_v46, %v4513_v29  ;;  %1120 = vst.msk [vmem:[#allocation2 + $0x31] sm:$0xff] %vm1115_vm1, %v949_v49  ;;  %1122 = vst.msk [vmem:[#allocation2 + $0x49] sm:$0xff] %vm1115_vm1, %v949_v49  ;;  %v770_v51 = vrot.slane %v510_v50, %v4513_v29 }
  0x56   : > { %v950_v57 = vcombine.low %v758_v41, %v762_v52  ;;  %v782_v58 = vrot.slane %v556_v48, %v4513_v29  ;;  %v525_v59 = vrot.slane %v511_v43, %v4505_v22  ;;  %v786_v60 = vrot.slane %v558_v54, %v4513_v29 }
  0x57   : > { %1117 = vst.msk [vmem:[#allocation2 + $0x9] sm:$0xff] %vm1115_vm1, %v932_v42  ;;  %1119 = vst.msk [vmem:[#allocation2 + $0x21] sm:$0xff] %vm1115_vm1, %v932_v42  ;;  %v967_v61 = vcombine.low %v774_v55, %v778_v56  ;;  %v575_v62 = vcombine.high %v4537_v47, %v4537_v47  ;;  %v583_v63 = vrot.slane %v4537_v47, %v4505_v22 }
  0x58   : > { %v951_v1 = vcombine.low %v766_v53, %v770_v51  ;;  %v958_v2 = vrot.slane %v950_v57, %v4517_v32  ;;  %v527_v3 = vcombine.high %v525_v59, %v525_v59  ;;  %v541_v34 = vrot.slane %v525_v59, %v4505_v22 }
  0x59   : > { %v968_v43 = vcombine.low %v782_v58, %v786_v60  ;;  %v975_v4 = vrot.slane %v967_v61, %v4517_v32  ;;  %v597_v5 = vrot.slane %v575_v62, %v4505_v22  ;;  %v605_v6 = vcombine.high %v583_v63, %v583_v63 }
  0x5a   : > { %v965_v7 = vrot.slane %v951_v1, %v4517_v32  ;;  %v555_v10 = vrot.slane %v527_v3, %v4505_v22  ;;  %v557_v11 = vcombine.high %v541_v34, %v541_v34  ;;  %v790_v15 = vrot.slane %v541_v34, %v4513_v29 }
  0x5b   : > { %v982_v47 = vrot.slane %v968_v43, %v4517_v32  ;;  %v607_v16 = vcombine.high %v597_v5, %v597_v5  ;;  %v806_v17 = vrot.slane %v583_v63, %v4513_v29  ;;  %v810_v18 = vrot.slane %v597_v5, %v4513_v29 }
  0x5c   : > { %v966_v20 = vcombine.low %v958_v2, %v965_v7  ;;  %v559_v21 = vcombine.high %v555_v10, %v555_v10  ;;  %v794_v23 = vrot.slane %v555_v10, %v4513_v29  ;;  %v798_v24 = vrot.slane %v557_v11, %v4513_v29 }
  0x5d   : > { %v983_v25 = vcombine.low %v975_v4, %v982_v47  ;;  %v814_v26 = vrot.slane %v605_v6, %v4513_v29  ;;  %v818_v27 = vrot.slane %v607_v16, %v4513_v29  ;;  %v1001_v28 = vcombine.low %v806_v17, %v810_v18 }
  0x5e   : > { %1121 = vst.msk [vmem:[#allocation2 + $0x39] sm:$0xff] %vm1115_vm1, %v966_v20  ;;  %1123 = vst.msk [vmem:[#allocation2 + $0x51] sm:$0xff] %vm1115_vm1, %v966_v20  ;;  %v802_v30 = vrot.slane %v559_v21, %v4513_v29  ;;  %v984_v31 = vcombine.low %v790_v15, %v794_v23  ;;  %v560_v33 = vcombine.high %v4521_v35, %v4521_v35 }
  0x5f   : > { %v616_v36 = vrot.slane %v4524_v38, %v4505_v22  ;;  %1124 = vst.msk [vmem:[#allocation2 + $0x61] sm:$0xff] %vm1115_vm1, %v983_v25  ;;  %1126 = vst.msk [vmem:[#allocation2 + $0x79] sm:$0xff] %vm1115_vm1, %v983_v25  ;;  %v1002_v37 = vcombine.low %v814_v26, %v818_v27  ;;  %v1009_v40 = vrot.slane %v1001_v28, %v4517_v32 }
  0x60   : > { %v609_v41 = vcombine.high %v4524_v38, %v4524_v38  ;;  %v665_v44 = vrot.slane %v4526_v39, %v4505_v22  ;;  %v985_v45 = vcombine.low %v798_v24, %v802_v30  ;;  %v992_v46 = vrot.slane %v984_v31, %v4517_v32 }
  0x61   : > { %v574_v35 = vrot.slane %v560_v33, %v4505_v22  ;;  %v624_v48 = vcombine.high %v616_v36, %v616_v36  ;;  %v1016_v49 = vrot.slane %v1002_v37, %v4517_v32  ;;  %v632_v50 = vrot.slane %v616_v36, %v4505_v22 }
  0x62   : > { %v623_v52 = vrot.slane %v609_v41, %v4505_v22  ;;  %v673_v53 = vcombine.high %v665_v44, %v665_v44  ;;  %v999_v42 = vrot.slane %v985_v45, %v4517_v32  ;;  %v681_v23 = vrot.slane %v665_v44, %v4505_v22 }
  0x63   : > { %v576_v54 = vcombine.high %v574_v35, %v574_v35  ;;  %v590_v38 = vrot.slane %v574_v35, %v4505_v22  ;;  %v646_v55 = vrot.slane %v624_v48, %v4505_v22  ;;  %v1017_v56 = vcombine.low %v1009_v40, %v1016_v49 }
  0x64   : > { %v654_v51 = vcombine.high %v632_v50, %v632_v50  ;;  %v838_v57 = vrot.slane %v632_v50, %v4513_v29  ;;  %v625_v58 = vcombine.high %v623_v52, %v623_v52  ;;  %v1000_v59 = vcombine.low %v992_v46, %v999_v42 }
  0x65   : > { %v604_v60 = vrot.slane %v576_v54, %v4505_v22  ;;  %v606_v61 = vcombine.high %v590_v38, %v590_v38  ;;  %v822_v62 = vrot.slane %v590_v38, %v4513_v29  ;;  %1128 = vst.msk [vmem:[#allocation2 + $0x91] sm:$0xff] %vm1115_vm1, %v1017_v56  ;;  %1130 = vst.msk [vmem:[#allocation2 + $0xa9] sm:$0xff] %vm1115_vm1, %v1017_v56 }
  0x66   : > { %v656_v63 = vcombine.high %v646_v55, %v646_v55  ;;  %v842_v1 = vrot.slane %v646_v55, %v4513_v29  ;;  %v846_v2 = vrot.slane %v654_v51, %v4513_v29  ;;  %v639_v3 = vrot.slane %v623_v52, %v4505_v22  ;;  %1125 = vst.msk [vmem:[#allocation2 + $0x69] sm:$0xff] %vm1115_vm1, %v1000_v59 }
  0x67   : > { %1127 = vst.msk [vmem:[#allocation2 + $0x81] sm:$0xff] %vm1115_vm1, %v1000_v59  ;;  %v608_v34 = vcombine.high %v604_v60, %v604_v60  ;;  %v826_v43 = vrot.slane %v604_v60, %v4513_v29  ;;  %v830_v4 = vrot.slane %v606_v61, %v4513_v29  ;;  %v653_v5 = vrot.slane %v625_v58, %v4505_v22 }
  0x68   : > { %v850_v6 = vrot.slane %v656_v63, %v4513_v29  ;;  %v1035_v7 = vcombine.low %v838_v57, %v842_v1  ;;  %v655_v10 = vcombine.high %v639_v3, %v639_v3  ;;  %v854_v11 = vrot.slane %v639_v3, %v4513_v29 }
  0x69   : > { %v834_v15 = vrot.slane %v608_v34, %v4513_v29  ;;  %v1018_v47 = vcombine.low %v822_v62, %v826_v43  ;;  %v657_v16 = vcombine.high %v653_v5, %v653_v5  ;;  %v858_v17 = vrot.slane %v653_v5, %v4513_v29 }
  0x6a   : > { %v1036_v18 = vcombine.low %v846_v2, %v850_v6  ;;  %v1043_v20 = vrot.slane %v1035_v7, %v4517_v32  ;;  %v862_v21 = vrot.slane %v655_v10, %v4513_v29  ;;  %v695_v30 = vrot.slane %v673_v53, %v4505_v22 }
  0x6b   : > { %v1019_v24 = vcombine.low %v830_v4, %v834_v15  ;;  %v1026_v25 = vrot.slane %v1018_v47, %v4517_v32  ;;  %v866_v26 = vrot.slane %v657_v16, %v4513_v29  ;;  %v1052_v27 = vcombine.low %v854_v11, %v858_v17 }
  0x6c   : > { %v1050_v28 = vrot.slane %v1036_v18, %v4517_v32  ;;  %v703_v31 = vcombine.high %v681_v23, %v681_v23  ;;  %v870_v33 = vrot.slane %v681_v23, %v4513_v29  ;;  %v658_v41 = vcombine.high %v4526_v39, %v4526_v39 }
  0x6d   : > { %v1033_v36 = vrot.slane %v1019_v24, %v4517_v32  ;;  %v1053_v37 = vcombine.low %v862_v21, %v866_v26  ;;  %v1060_v40 = vrot.slane %v1052_v27, %v4517_v32  ;;  %v705_v45 = vcombine.high %v695_v30, %v695_v30 }
  0x6e   : > { %v1051_v44 = vcombine.low %v1043_v20, %v1050_v28  ;;  %v874_v46 = vrot.slane %v695_v30, %v4513_v29  ;;  %v878_v35 = vrot.slane %v703_v31, %v4513_v29  ;;  %v672_v50 = vrot.slane %v658_v41, %v4505_v22 }
  0x6f   : > { %v1034_v48 = vcombine.low %v1026_v25, %v1033_v36  ;;  %v1067_v49 = vrot.slane %v1053_v37, %v4517_v32  ;;  %v882_v52 = vrot.slane %v705_v45, %v4513_v29 }
  0x70   : > { %1132 = vst.msk [vmem:[#allocation2 + $0xc1] sm:$0xff] %vm1115_vm1, %v1051_v44  ;;  %1134 = vst.msk [vmem:[#allocation2 + $0xd9] sm:$0xff] %vm1115_vm1, %v1051_v44  ;;  %v1069_v53 = vcombine.low %v870_v33, %v874_v46  ;;  %v674_v42 = vcombine.high %v672_v50, %v672_v50  ;;  %v688_v54 = vrot.slane %v672_v50, %v4505_v22 }
  0x71   : > { %1129 = vst.msk [vmem:[#allocation2 + $0x99] sm:$0xff] %vm1115_vm1, %v1034_v48  ;;  %1131 = vst.msk [vmem:[#allocation2 + $0xb1] sm:$0xff] %vm1115_vm1, %v1034_v48  ;;  %v1068_v39 = vcombine.low %v1060_v40, %v1067_v49  ;;  %v1070_v38 = vcombine.low %v878_v35, %v882_v52 }
  0x72   : > { %v1077_v55 = vrot.slane %v1069_v53, %v4517_v32  ;;  %v702_v56 = vrot.slane %v674_v42, %v4505_v22  ;;  %v704_v51 = vcombine.high %v688_v54, %v688_v54  ;;  %v886_v57 = vrot.slane %v688_v54, %v4513_v29 }
  0x73   : > { %1133 = vst.msk [vmem:[#allocation2 + $0xc9] sm:$0xff] %vm1115_vm1, %v1068_v39  ;;  %1135 = vst.msk [vmem:[#allocation2 + $0xe1] sm:$0xff] %vm1115_vm1, %v1068_v39  ;;  %v1084_v58 = vrot.slane %v1070_v38, %v4517_v32 }
  0x74   : > { %v706_v59 = vcombine.high %v702_v56, %v702_v56  ;;  %v890_v60 = vrot.slane %v702_v56, %v4513_v29  ;;  %v894_v61 = vrot.slane %v704_v51, %v4513_v29 }
  0x75   : > { %v1085_v62 = vcombine.low %v1077_v55, %v1084_v58 }
  0x76   : > { %v898_v63 = vrot.slane %v706_v59, %v4513_v29  ;;  %v1086_v1 = vcombine.low %v886_v57, %v890_v60 }
  0x77   : > { %1136 = vst.msk [vmem:[#allocation2 + $0xf1] sm:$0xff] %vm1115_vm1, %v1085_v62  ;;  %1138 = vst.msk [vmem:[#allocation2 + $0x109] sm:$0xff] %vm1115_vm1, %v1085_v62 }
  0x78   : > { %v1087_v2 = vcombine.low %v894_v61, %v898_v63  ;;  %v1094_v3 = vrot.slane %v1086_v1, %v4517_v32 }
  0x7a   : > { %v1101_v34 = vrot.slane %v1087_v2, %v4517_v32  ;;  %1142 = sbr.rel (%p3497_p8) target bundleno = 131 (0x83), region = 60 }
  0x7c   : > { %v1102_v43 = vcombine.low %v1094_v3, %v1101_v34 }
  0x7e   : > { %1137 = vst.msk [vmem:[#allocation2 + $0xf9] sm:$0xff] %vm1115_vm1, %v1102_v43  ;;  %1139 = vst.msk [vmem:[#allocation2 + $0x111] sm:$0xff] %vm1115_vm1, %v1102_v43 }
  0x7f   : > { %vm1145_vm2 = vcmask 58368   ;;  %v4262_v4 = vmov 0.0  }
  0x80   : > { %1143 = vst.msk [vmem:[#allocation2] sm:$0xff] %vm1115_vm1, %v4262_v4  ;;  %1144 = vst.msk [vmem:[#allocation2 + $0x8] sm:$0xff] %vm1115_vm1, %v4262_v4 }
  0x81   : > { %1147 = vst.msk [vmem:[#allocation2 + $0x18] sm:$0xff] %vm1115_vm1, %v4262_v4  ;;  %1148 = vst.msk [vmem:[#allocation2 + $0x20] sm:$0xff] %vm1115_vm1, %v4262_v4 }
  0x82   : > { %1146 = vst.msk [vmem:[#allocation2 + $0x10] sm:$0x3] %vm1145_vm2, %v4262_v4  ;;  %1149 = vst.msk [vmem:[#allocation2 + $0x28] sm:$0x3] %vm1145_vm2, %v4262_v4 }
  0x83 PF: > { %p3498_p0 = scmp.ne.s32.totalorder %s4238_s30, 1 }
  0x85   : > { %1152 = sbr.rel (%p3498_p0) target bundleno = 142 (0x8e), region = 64 }
  0x8a   : > { %vm1156_vm3 = vcmask 58368   ;;  %v4263_v5 = vmov 0.0  }
  0x8b   : > { %1154 = vst.msk [vmem:[#allocation2 + $0xf0] sm:$0xff] %vm1115_vm1, %v4263_v5  ;;  %1155 = vst.msk [vmem:[#allocation2 + $0xf8] sm:$0xff] %vm1115_vm1, %v4263_v5 }
  0x8c   : > { %1158 = vst.msk [vmem:[#allocation2 + $0x108] sm:$0xff] %vm1115_vm1, %v4263_v5  ;;  %1159 = vst.msk [vmem:[#allocation2 + $0x110] sm:$0xff] %vm1115_vm1, %v4263_v5 }
  0x8d   : > { %1157 = vst.msk [vmem:[#allocation2 + $0x100] sm:$0x3] %vm1156_vm3, %v4263_v5  ;;  %1160 = vst.msk [vmem:[#allocation2 + $0x118] sm:$0x3] %vm1156_vm3, %v4263_v5 }
  0x8e PF: > { %v1219_v6 = vld [vmem:[#allocation2 + $0x7a] sm:$0xff]  ;;  %s4264_s14 = smov 16   ;;  %s4265_s18 = smov 8   ;;  %v1220_v15 = vld [vmem:[#allocation2 + $0x82] sm:$0xff]  ;;  %v1197_v17 = vld [vmem:[#allocation2 + $0x91] sm:$0xff]  ;;  %vm1449_vm4 = vcmask 130048  }
  0x8f   : > { %v1195_v7 = vld [vmem:[#allocation2 + $0x79] sm:$0xff]  ;;  %1373 = vrot.lane.b32.xlu1 %v1219_v6, %s4264_s14  ;;  %v1196_v10 = vld [vmem:[#allocation2 + $0x81] sm:$0xff]  ;;  %v1186_v47 = vld [vmem:[#allocation2 + $0x9] sm:$0xff]  ;;  %vm1478_vm5 = vcmask 195584  }
  0x90   : > { %1277 = vrot.lane.b32.xlu0 %v1195_v7, %s4265_s18  ;;  %v1185_v11 = vld [vmem:[#allocation2 + $0x1] sm:$0xff]  ;;  %v1210_v18 = vld [vmem:[#allocation2 + $0xa] sm:$0xff]  ;;  %v1198_v20 = vld [vmem:[#allocation2 + $0x99] sm:$0xff] }
  0x91   : > { %v1209_v16 = vld [vmem:[#allocation2 + $0x2] sm:$0xff]  ;;  %v1477_v21 = vld [vmem:[%s5636_s2 + $0x10] sm:$0xff]  ;;  %v1187_v25 = vld [vmem:[#allocation2 + $0x19] sm:$0xff] }
  0x92   : > { %v1476_v23 = vld [vmem:[%s5636_s2 + $0x8] sm:$0xff]  ;;  %v1221_v24 = vld [vmem:[#allocation2 + $0x92] sm:$0xff]  ;;  %4028 = vmatprep.subr.mxu1 %v1477_v21  ;;  %3780 = vmatprep.subr.mxu0 %v1477_v21  ;;  %v1475_v26 = vld [vmem:[%s5636_s2] sm:$0xff] }
  0x93   : > { %1257 = vrot.lane.b32.xlu1 %v1185_v11, %s4265_s18  ;;  %4031 = vmatpush3.msra.mxu1 %v1477_v21  ;;  %v1222_v27 = vld [vmem:[#allocation2 + $0x9a] sm:$0xff]  ;;  %v1199_v31 = vld [vmem:[#allocation2 + $0xa9] sm:$0xff]  ;;  %v1200_v36 = vld [vmem:[#allocation2 + $0xb1] sm:$0xff] }
  0x94   : > { %1279 = vrot.lane.b32.xlu0 %v1196_v10, %s4265_s18  ;;  %3781 = vmatpush3.msra.mxu0 %v1477_v21  ;;  %v1188_v28 = vld [vmem:[#allocation2 + $0x21] sm:$0xff]  ;;  %v1223_v37 = vld [vmem:[#allocation2 + $0xaa] sm:$0xff]  ;;  %v1224_v41 = vld [vmem:[#allocation2 + $0xb2] sm:$0xff] }
  0x95   : > { %4029 = vmatprep.subr.mxu1 %v1476_v23  ;;  %3782 = vmatprep.subr.mxu0 %v1476_v23  ;;  %v1211_v30 = vld [vmem:[#allocation2 + $0x1a] sm:$0xff]  ;;  %v1212_v33 = vld [vmem:[#allocation2 + $0x22] sm:$0xff]  ;;  %v1189_v40 = vld [vmem:[#allocation2 + $0x31] sm:$0xff] }
  0x96   : > { %4032 = vmatpush3.msra.mxu1 %v1476_v23  ;;  %3783 = vmatpush3.msra.mxu0 %v1476_v23  ;;  %v1190_v44 = vld [vmem:[#allocation2 + $0x39] sm:$0xff]  ;;  %v1201_v46 = vld [vmem:[#allocation2 + $0xc1] sm:$0xff]  ;;  %v1202_v49 = vld [vmem:[#allocation2 + $0xc9] sm:$0xff] }
  0x97   : > { %1259 = vrot.lane.b32.xlu1 %v1186_v47, %s4265_s18  ;;  %4030 = vmatprep.subr.mxu1 %v1475_v26  ;;  %v1213_v45 = vld [vmem:[#allocation2 + $0x32] sm:$0xff]  ;;  %v4733_v35 = vld [vmem:[%s5636_s2 + $0x28] sm:$0xff]  ;;  %v1214_v48 = vld [vmem:[#allocation2 + $0x3a] sm:$0xff] }
  0x98   : > { %1375 = vrot.lane.b32.xlu0 %v1220_v15, %s4264_s14  ;;  %3784 = vmatprep.subr.mxu0 %v1475_v26  ;;  %v4741_v50 = vld [vmem:[%s5636_s2 + $0x40] sm:$0xff]  ;;  %v1191_v53 = vld [vmem:[#allocation2 + $0x49] sm:$0xff]  ;;  %v1192_v42 = vld [vmem:[#allocation2 + $0x51] sm:$0xff] }
  0x99   : > { %4033 = vmatpush3.msra.mxu1 %v1475_v26  ;;  %3785 = vmatpush3.msra.mxu0 %v1475_v26  ;;  %v1225_v52 = vld [vmem:[#allocation2 + $0xc2] sm:$0xff]  ;;  %v1226_v39 = vld [vmem:[#allocation2 + $0xca] sm:$0xff]  ;;  %v1203_v38 = vld [vmem:[#allocation2 + $0xd9] sm:$0xff] }
  0x9a   : > { %3816 = vmatprep.subr.mxu1 %v4733_v35  ;;  %3852 = vmatprep.subr.mxu0 %v4741_v50  ;;  %v1215_v54 = vld [vmem:[#allocation2 + $0x4a] sm:$0xff]  ;;  %v1216_v55 = vld [vmem:[#allocation2 + $0x52] sm:$0xff]  ;;  %v1204_v56 = vld [vmem:[#allocation2 + $0xe1] sm:$0xff] }
  0x9b   : > { %1281 = vrot.lane.b32.xlu1 %v1197_v17, %s4265_s18  ;;  %v1227_v51 = vld [vmem:[#allocation2 + $0xda] sm:$0xff]  ;;  %v1228_v58 = vld [vmem:[#allocation2 + $0xe2] sm:$0xff]  ;;  %v1218_v61 = vld [vmem:[#allocation2 + $0x6a] sm:$0xff] }
  0x9c   : > { %1353 = vrot.lane.b32.xlu0 %v1209_v16, %s4264_s14  ;;  %v1193_v57 = vld [vmem:[#allocation2 + $0x61] sm:$0xff]  ;;  %v1194_v59 = vld [vmem:[#allocation2 + $0x69] sm:$0xff]  ;;  %v1205_v62 = vld [vmem:[#allocation2 + $0xf1] sm:$0xff] }
  0x9d   : > { %v1217_v60 = vld [vmem:[#allocation2 + $0x62] sm:$0xff]  ;;  %v1206_v63 = vld [vmem:[#allocation2 + $0xf9] sm:$0xff]  ;;  %v1208_v34 = vld [vmem:[#allocation2 + $0x111] sm:$0xff] }
  0x9e   : > { %v1229_v1 = vld [vmem:[#allocation2 + $0xf2] sm:$0xff]  ;;  %v1230_v2 = vld [vmem:[#allocation2 + $0xfa] sm:$0xff]  ;;  %v1207_v3 = vld [vmem:[#allocation2 + $0x109] sm:$0xff] }
  0x9f   : > { %1283 = vrot.lane.b32.xlu1 %v1198_v20, %s4265_s18  ;;  %v1231_v43 = vld [vmem:[#allocation2 + $0x10a] sm:$0xff]  ;;  %v1232_v4 = vld [vmem:[#allocation2 + $0x112] sm:$0xff]  ;;  %v1172_v16 = vld [vmem:[#allocation2 + $0x80] sm:$0xff] }
  0xa0   : > { %1355 = vrot.lane.b32.xlu0 %v1210_v18, %s4264_s14  ;;  %v1171_v5 = vld [vmem:[#allocation2 + $0x78] sm:$0xff]  ;;  %v1161_v21 = vld [vmem:[#allocation2] sm:$0xff] }
  0xa3   : > { %1261 = vrot.lane.b32.xlu1 %v1187_v25, %s4265_s18  ;;  %v3520_v25 = vld [vmem:[%s5636_s2 + $0x18] sm:$0xff] }
  0xa4   : > { %1377 = vrot.lane.b32.xlu0 %v1221_v24, %s4264_s14  ;;  %v3521_v24 = vld [vmem:[%s5636_s2 + $0x20] sm:$0xff] }
  0xa7   : > { %1263 = vrot.lane.b32.xlu1 %v1188_v28, %s4265_s18 }
  0xa8   : > { %1379 = vrot.lane.b32.xlu0 %v1222_v27, %s4264_s14 }
  0xab   : > { %1285 = vrot.lane.b32.xlu1 %v1199_v31, %s4265_s18 }
  0xac   : > { %1357 = vrot.lane.b32.xlu0 %v1211_v30, %s4264_s14  ;;  %v1162_v30 = vld [vmem:[#allocation2 + $0x8] sm:$0xff] }
  0xaf   : > { %1287 = vrot.lane.b32.xlu1 %v1200_v36, %s4265_s18 }
  0xb0   : > { %1359 = vrot.lane.b32.xlu0 %v1212_v33, %s4264_s14 }
  0xb3   : > { %1265 = vrot.lane.b32.xlu1 %v1189_v40, %s4265_s18  ;;  %v1173_v40 = vld [vmem:[#allocation2 + $0x90] sm:$0xff] }
  0xb4   : > { %1381 = vrot.lane.b32.xlu0 %v1223_v37, %s4264_s14 }
  0xb7   : > { %1267 = vrot.lane.b32.xlu1 %v1190_v44, %s4265_s18  ;;  %v3544_v44 = vld [vmem:[%s5636_s2 + $0x38] sm:$0xff] }
  0xb8   : > { %1383 = vrot.lane.b32.xlu0 %v1224_v41, %s4264_s14 }
  0xbb   : > { %1289 = vrot.lane.b32.xlu1 %v1201_v46, %s4265_s18 }
  0xbc   : > { %1361 = vrot.lane.b32.xlu0 %v1213_v45, %s4264_s14  ;;  %v3543_v45 = vld [vmem:[%s5636_s2 + $0x30] sm:$0xff] }
  0xbf   : > { %1291 = vrot.lane.b32.xlu1 %v1202_v49, %s4265_s18  ;;  %v1174_v49 = vld [vmem:[#allocation2 + $0x98] sm:$0xff] }
  0xc0   : > { %1363 = vrot.lane.b32.xlu0 %v1214_v48, %s4264_s14 }
  0xc3   : > { %1269 = vrot.lane.b32.xlu1 %v1191_v53, %s4265_s18 }
  0xc4   : > { %1385 = vrot.lane.b32.xlu0 %v1225_v52, %s4264_s14 }
  0xc7   : > { %1271 = vrot.lane.b32.xlu1 %v1192_v42, %s4265_s18  ;;  %v1163_v42 = vld [vmem:[#allocation2 + $0x18] sm:$0xff] }
  0xc8   : > { %1387 = vrot.lane.b32.xlu0 %v1226_v39, %s4264_s14 }
  0xcb   : > { %1293 = vrot.lane.b32.xlu1 %v1203_v38, %s4265_s18 }
  0xcc   : > { %1365 = vrot.lane.b32.xlu0 %v1215_v54, %s4264_s14 }
  0xcf   : > { %1295 = vrot.lane.b32.xlu1 %v1204_v56, %s4265_s18 }
  0xd0   : > { %1367 = vrot.lane.b32.xlu0 %v1216_v55, %s4264_s14 }
  0xd3   : > { %1273 = vrot.lane.b32.xlu1 %v1193_v57, %s4265_s18 }
  0xd4   : > { %1389 = vrot.lane.b32.xlu0 %v1227_v51, %s4264_s14  ;;  %v1164_v51 = vld [vmem:[#allocation2 + $0x20] sm:$0xff] }
  0xd7   : > { %1275 = vrot.lane.b32.xlu1 %v1194_v59, %s4265_s18 }
  0xd8   : > { %1391 = vrot.lane.b32.xlu0 %v1228_v58, %s4264_s14 }
  0xdb   : > { %1371 = vrot.lane.b32.xlu1 %v1218_v61, %s4264_s14  ;;  %v1175_v61 = vld [vmem:[#allocation2 + $0xa8] sm:$0xff] }
  0xdc   : > { %1369 = vrot.lane.b32.xlu0 %v1217_v60, %s4264_s14 }
  0xdf   : > { %1299 = vrot.lane.b32.xlu1 %v1206_v63, %s4265_s18 }
  0xe0   : > { %1297 = vrot.lane.b32.xlu0 %v1205_v62, %s4265_s18 }
  0xe3   : > { %1395 = vrot.lane.b32.xlu1 %v1230_v2, %s4264_s14 }
  0xe4   : > { %1393 = vrot.lane.b32.xlu0 %v1229_v1, %s4264_s14 }
  0xe7   : > { %1303 = vrot.lane.b32.xlu1 %v1208_v34, %s4265_s18 }
  0xe8   : > { %1301 = vrot.lane.b32.xlu0 %v1207_v3, %s4265_s18  ;;  %v1176_v3 = vld [vmem:[#allocation2 + $0xb0] sm:$0xff] }
  0xeb   : > { %1399 = vrot.lane.b32.xlu1 %v1232_v4, %s4264_s14 }
  0xec   : > { %1397 = vrot.lane.b32.xlu0 %v1231_v43, %s4264_s14 }
 0x101   : > { %v1374_v6 = vpop.permute.xlu1 %1373 }
 0x102   : > { %v1278_v7 = vpop.permute.xlu0 %1277 }
 0x103   : > { %v1435_v10 = vsel %vm1115_vm1, %v1171_v5, %v1278_v7 }
 0x104   : > { %v4768_v11 = vsel %vm1449_vm4, %v1435_v10, %v1374_v6  ;;  %v1165_v6 = vld [vmem:[#allocation2 + $0x30] sm:$0xff] }
 0x105   : > { %3801 = vmatprep.mubr.msk.f32.mxu1 %vm1478_vm5, %v4768_v11  ;;  %v1258_v47 = vpop.permute.xlu1 %1257 }
 0x106   : > { %v1280_v15 = vpop.permute.xlu0 %1279  ;;  %v1425_v26 = vsel %vm1115_vm1, %v1161_v21, %v1258_v47 }
 0x107   : > { %v1436_v17 = vsel %vm1115_vm1, %v1172_v16, %v1280_v15  ;;  %v1166_v16 = vld [vmem:[#allocation2 + $0x38] sm:$0xff] }
 0x109   : > { %v1260_v20 = vpop.permute.xlu1 %1259 }
 0x10a   : > { %v1376_v18 = vpop.permute.xlu0 %1375  ;;  %v1426_v33 = vsel %vm1115_vm1, %v1162_v30, %v1260_v20  ;;  %v1178_v30 = vld [vmem:[#allocation2 + $0xc8] sm:$0xff] }
 0x10b   : > { %v4774_v23 = vsel %vm1449_vm4, %v1436_v17, %v1376_v18 }
 0x10c   : > { %3802 = vmatmul.mubr.msk.f32.vlgmr.msra.gmra.mxu1 %vm1478_vm5, %v4774_v23 }
 0x10d   : > { %3817 = vmatpush3.msra.mxu1 %v4733_v35  ;;  %v1282_v28 = vpop.permute.xlu1 %1281 }
 0x10e   : > { %v1354_v27 = vpop.permute.xlu0 %1353  ;;  %3818 = vmatprep.subr.mxu1 %v3521_v24  ;;  %v1437_v46 = vsel %vm1115_vm1, %v1173_v40, %v1282_v28  ;;  %v1167_v40 = vld [vmem:[#allocation2 + $0x48] sm:$0xff] }
 0x10f   : > { %v1450_v31 = vsel %vm1449_vm4, %v1425_v26, %v1354_v27  ;;  %3819 = vmatpush3.msra.mxu1 %v3521_v24  ;;  %v1177_v24 = vld [vmem:[#allocation2 + $0xc0] sm:$0xff] }
 0x110   : > { %3786 = vmatprep.mubr.msk.f32.mxu0 %vm1478_vm5, %v1450_v31  ;;  %3820 = vmatprep.subr.mxu1 %v3520_v25 }
 0x111   : > { %3821 = vmatpush3.msra.mxu1 %v3520_v25  ;;  %v1284_v37 = vpop.permute.xlu1 %1283 }
 0x112   : > { %v1356_v36 = vpop.permute.xlu0 %1355 }
 0x113   : > { %v1451_v41 = vsel %vm1449_vm4, %v1426_v33, %v1356_v36 }
 0x114   : > { %3787 = vmatmul.mubr.msk.f32.vlgmr.msra.gmra.mxu0 %vm1478_vm5, %v1451_v41 }
 0x115   : > { %3853 = vmatpush3.msra.mxu0 %v4741_v50  ;;  %v1262_v48 = vpop.permute.xlu1 %1261  ;;  %v1438_v50 = vsel %vm1115_vm1, %v1174_v49, %v1284_v37 }
 0x116   : > { %v1378_v35 = vpop.permute.xlu0 %1377  ;;  %3854 = vmatprep.subr.mxu0 %v3544_v44  ;;  %v1427_v38 = vsel %vm1115_vm1, %v1163_v42, %v1262_v48 }
 0x117   : > { %v4800_v52 = vsel %vm1449_vm4, %v1437_v46, %v1378_v35  ;;  %3855 = vmatpush3.msra.mxu0 %v3544_v44  ;;  %v1168_v35 = vld [vmem:[#allocation2 + $0x50] sm:$0xff] }
 0x118   : > { %3804 = vmatprep.mubr.msk.f32.mxu1 %vm1478_vm5, %v4800_v52  ;;  %3856 = vmatprep.subr.mxu0 %v3543_v45 }
 0x119   : > { %3857 = vmatpush3.msra.mxu0 %v3543_v45  ;;  %v1264_v39 = vpop.permute.xlu1 %1263 }
 0x11a   : > { %v1380_v53 = vpop.permute.xlu0 %1379  ;;  %v1428_v58 = vsel %vm1115_vm1, %v1164_v51, %v1264_v39  ;;  %v1179_v39 = vld [vmem:[#allocation2 + $0xd8] sm:$0xff]  ;;  %v1180_v51 = vld [vmem:[#allocation2 + $0xe0] sm:$0xff] }
 0x11b   : > { %v4806_v54 = vsel %vm1449_vm4, %v1438_v50, %v1380_v53 }
 0x11c   : > { %3805 = vmatmul.mubr.msk.f32.gmra.mxu1 %vm1478_vm5, %v4806_v54 }
 0x11d   : > { %v1286_v56 = vpop.permute.xlu1 %1285 }
 0x11e   : > { %v1358_v55 = vpop.permute.xlu0 %1357  ;;  %v1439_v63 = vsel %vm1115_vm1, %v1175_v61, %v1286_v56 }
 0x11f   : > { %v4812_v57 = vsel %vm1449_vm4, %v1427_v38, %v1358_v55 }
 0x120   : > { %3789 = vmatprep.mubr.msk.f32.mxu0 %vm1478_vm5, %v4812_v57 }
 0x121   : > { %v1288_v60 = vpop.permute.xlu1 %1287 }
 0x122   : > { %v1360_v59 = vpop.permute.xlu0 %1359  ;;  %v1440_v43 = vsel %vm1115_vm1, %v1176_v3, %v1288_v60 }
 0x123   : > { %v4818_v62 = vsel %vm1449_vm4, %v1428_v58, %v1360_v59 }
 0x124   : > { %3790 = vmatmul.mubr.msk.f32.gmra.mxu0 %vm1478_vm5, %v4818_v62 }
 0x125   : > { %v1266_v2 = vpop.permute.xlu1 %1265 }
 0x126   : > { %v1382_v1 = vpop.permute.xlu0 %1381  ;;  %v1429_v10 = vsel %vm1115_vm1, %v1165_v6, %v1266_v2  ;;  %v1170_v2 = vld [vmem:[#allocation2 + $0x68] sm:$0xff] }
 0x127   : > { %v4824_v34 = vsel %vm1449_vm4, %v1439_v63, %v1382_v1  ;;  %v1169_v63 = vld [vmem:[#allocation2 + $0x60] sm:$0xff] }
 0x128   : > { %3807 = vmatprep.mubr.msk.f32.mxu1 %vm1478_vm5, %v4824_v34 }
 0x129   : > { %v1268_v5 = vpop.permute.xlu1 %1267 }
 0x12a   : > { %v1384_v4 = vpop.permute.xlu0 %1383  ;;  %v1430_v18 = vsel %vm1115_vm1, %v1166_v16, %v1268_v5 }
 0x12b   : > { %v4830_v7 = vsel %vm1449_vm4, %v1440_v43, %v1384_v4 }
 0x12c   : > { %3808 = vmatmul.mubr.msk.f32.gmra.mxu1 %vm1478_vm5, %v4830_v7 }
 0x12d   : > { %v1290_v47 = vpop.permute.xlu1 %1289 }
 0x12e   : > { %v1362_v15 = vpop.permute.xlu0 %1361  ;;  %v1441_v26 = vsel %vm1115_vm1, %v1177_v24, %v1290_v47  ;;  %v1183_v47 = vld [vmem:[#allocation2 + $0x108] sm:$0xff] }
 0x12f   : > { %v1454_v17 = vsel %vm1449_vm4, %v1429_v10, %v1362_v15 }
 0x130   : > { %3792 = vmatprep.mubr.msk.f32.mxu0 %vm1478_vm5, %v1454_v17 }
 0x131   : > { %v1292_v21 = vpop.permute.xlu1 %1291 }
 0x132   : > { %v1364_v20 = vpop.permute.xlu0 %1363  ;;  %v1442_v33 = vsel %vm1115_vm1, %v1178_v30, %v1292_v21  ;;  %v1184_v21 = vld [vmem:[#allocation2 + $0x110] sm:$0xff] }
 0x133   : > { %v1455_v25 = vsel %vm1449_vm4, %v1430_v18, %v1364_v20 }
 0x134   : > { %3793 = vmatmul.mubr.msk.f32.gmra.mxu0 %vm1478_vm5, %v1455_v25 }
 0x135   : > { %v1270_v28 = vpop.permute.xlu1 %1269 }
 0x136   : > { %v1386_v27 = vpop.permute.xlu0 %1385  ;;  %v1431_v44 = vsel %vm1115_vm1, %v1167_v40, %v1270_v28 }
 0x137   : > { %v4842_v31 = vsel %vm1449_vm4, %v1441_v26, %v1386_v27 }
 0x138   : > { %3810 = vmatprep.mubr.msk.f32.mxu1 %vm1478_vm5, %v4842_v31 }
 0x139   : > { %v1272_v37 = vpop.permute.xlu1 %1271 }
 0x13a   : > { %v1388_v36 = vpop.permute.xlu0 %1387  ;;  %v1432_v49 = vsel %vm1115_vm1, %v1168_v35, %v1272_v37 }
 0x13b   : > { %v4848_v41 = vsel %vm1449_vm4, %v1442_v33, %v1388_v36 }
 0x13c   : > { %3811 = vmatmul.mubr.msk.f32.gmra.mxu1 %vm1478_vm5, %v4848_v41 }
 0x13d   : > { %v1294_v46 = vpop.permute.xlu1 %1293 }
 0x13e   : > { %v1366_v45 = vpop.permute.xlu0 %1365  ;;  %v1443_v38 = vsel %vm1115_vm1, %v1179_v39, %v1294_v46 }
 0x13f   : > { %v1456_v48 = vsel %vm1449_vm4, %v1431_v44, %v1366_v45 }
 0x140   : > { %3795 = vmatprep.mubr.msk.f32.mxu0 %vm1478_vm5, %v1456_v48 }
 0x141   : > { %v1296_v53 = vpop.permute.xlu1 %1295 }
 0x142   : > { %v1368_v50 = vpop.permute.xlu0 %1367  ;;  %v1444_v59 = vsel %vm1115_vm1, %v1180_v51, %v1296_v53 }
 0x143   : > { %v1457_v42 = vsel %vm1449_vm4, %v1432_v49, %v1368_v50 }
 0x144   : > { %3796 = vmatmul.mubr.msk.f32.gmra.mxu0 %vm1478_vm5, %v1457_v42 }
 0x145   : > { %v1274_v56 = vpop.permute.xlu1 %1273 }
 0x146   : > { %v1390_v55 = vpop.permute.xlu0 %1389  ;;  %v1433_v3 = vsel %vm1115_vm1, %v1169_v63, %v1274_v56  ;;  %v4959_v56 = vld [vmem:[%s5637_s3] ss:$0 sm:$0xff] }
 0x147   : > { %v1468_v58 = vsel %vm1449_vm4, %v1443_v38, %v1390_v55 }
 0x148   : > { %3813 = vmatprep.mubr.msk.f32.mxu1 %vm1478_vm5, %v1468_v58 }
 0x149   : > { %v1276_v61 = vpop.permute.xlu1 %1275 }
 0x14a   : > { %v1392_v60 = vpop.permute.xlu0 %1391  ;;  %v1434_v43 = vsel %vm1115_vm1, %v1170_v2, %v1276_v61 }
 0x14b   : > { %v1469_v1 = vsel %vm1449_vm4, %v1444_v59, %v1392_v60 }
 0x14c   : > { %3814 = vmatmul.mubr.msk.f32.gmra.mxu1 %vm1478_vm5, %v1469_v1 }
 0x14d   : > { %3822 = vmatprep.mubr.msk.f32.mxu1 %vm1478_vm5, %v4812_v57  ;;  %v1372_v5 = vpop.permute.xlu1 %1371 }
 0x14e   : > { %v1370_v4 = vpop.permute.xlu0 %1369  ;;  %v1459_v10 = vsel %vm1449_vm4, %v1434_v43, %v1372_v5 }
 0x14f   : > { %v1458_v6 = vsel %vm1449_vm4, %v1433_v3, %v1370_v4 }
 0x150   : > { %3798 = vmatprep.mubr.msk.f32.mxu0 %vm1478_vm5, %v1458_v6  ;;  %3823 = vmatmul.mubr.msk.f32.vlgmr.msra.gmra.mxu1 %vm1478_vm5, %v4818_v62 }
 0x151   : > { %3799 = vmatmul.mubr.msk.f32.gmra.mxu0 %vm1478_vm5, %v1459_v10  ;;  %3825 = vmatprep.mubr.msk.f32.mxu1 %vm1478_vm5, %v1454_v17  ;;  %v1300_v62 = vpop.permute.xlu1 %1299 }
 0x152   : > { %3858 = vmatprep.mubr.msk.f32.mxu0 %vm1478_vm5, %v1454_v17  ;;  %v1298_v57 = vpop.permute.xlu0 %1297 }
 0x154   : > { %3826 = vmatmul.mubr.msk.f32.gmra.mxu1 %vm1478_vm5, %v1455_v25 }
 0x155   : > { %3828 = vmatprep.mubr.msk.f32.mxu1 %vm1478_vm5, %v1456_v48  ;;  %3859 = vmatmul.mubr.msk.f32.vlgmr.msra.gmra.mxu0 %vm1478_vm5, %v1455_v25 }
 0x156   : > { %3861 = vmatprep.mubr.msk.f32.mxu0 %vm1478_vm5, %v1456_v48  ;;  %v1394_v15 = vpop.permute.xlu0 %1393 }
 0x158   : > { %3829 = vmatmul.mubr.msk.f32.gmra.mxu1 %vm1478_vm5, %v1457_v42 }
 0x159   : > { %3831 = vmatprep.mubr.msk.f32.mxu1 %vm1478_vm5, %v1458_v6  ;;  %3862 = vmatmul.mubr.msk.f32.gmra.mxu0 %vm1478_vm5, %v1457_v42 }
 0x15a   : > { %3864 = vmatprep.mubr.msk.f32.mxu0 %vm1478_vm5, %v1458_v6 }
 0x15c   : > { %3832 = vmatmul.mubr.msk.f32.gmra.mxu1 %vm1478_vm5, %v1459_v10 }
 0x15d   : > { %3834 = vmatprep.mubr.msk.f32.mxu1 %vm1478_vm5, %v4768_v11  ;;  %3865 = vmatmul.mubr.msk.f32.gmra.mxu0 %vm1478_vm5, %v1459_v10 }
 0x15e   : > { %3867 = vmatprep.mubr.msk.f32.mxu0 %vm1478_vm5, %v4768_v11  ;;  %v1396_v11 = vpop.permute.xlu1 %1395 }
 0x160   : > { %3835 = vmatmul.mubr.msk.f32.gmra.mxu1 %vm1478_vm5, %v4774_v23 }
 0x161   : > { %3837 = vmatprep.mubr.msk.f32.mxu1 %vm1478_vm5, %v4800_v52  ;;  %3868 = vmatmul.mubr.msk.f32.gmra.mxu0 %vm1478_vm5, %v4774_v23  ;;  %v1181_v23 = vld [vmem:[#allocation2 + $0xf0] sm:$0xff] }
 0x162   : > { %3870 = vmatprep.mubr.msk.f32.mxu0 %vm1478_vm5, %v4800_v52  ;;  %v1302_v52 = vpop.permute.xlu0 %1301 }
 0x163   : > { %v1447_v18 = vsel %vm1115_vm1, %v1183_v47, %v1302_v52 }
 0x164   : > { %3838 = vmatmul.mubr.msk.f32.gmra.mxu1 %vm1478_vm5, %v4806_v54 }
 0x165   : > { %3840 = vmatprep.mubr.msk.f32.mxu1 %vm1478_vm5, %v4824_v34  ;;  %3871 = vmatmul.mubr.msk.f32.gmra.mxu0 %vm1478_vm5, %v4806_v54  ;;  %v1445_v54 = vsel %vm1115_vm1, %v1181_v23, %v1298_v57 }
 0x166   : > { %3873 = vmatprep.mubr.msk.f32.mxu0 %vm1478_vm5, %v4824_v34  ;;  %v1182_v34 = vld [vmem:[#allocation2 + $0xf8] sm:$0xff]  ;;  %v1470_v17 = vsel %vm1449_vm4, %v1445_v54, %v1394_v15  ;;  %v1398_v20 = vpop.permute.xlu0 %1397 }
 0x167   : > { %v1446_v16 = vsel %vm1115_vm1, %v1182_v34, %v1300_v62  ;;  %v1472_v25 = vsel %vm1449_vm4, %v1447_v18, %v1398_v20 }
 0x168   : > { %3841 = vmatmul.mubr.msk.f32.gmra.mxu1 %vm1478_vm5, %v4830_v7  ;;  %v1471_v24 = vsel %vm1449_vm4, %v1446_v16, %v1396_v11 }
 0x169   : > { %3843 = vmatprep.mubr.msk.f32.mxu1 %vm1478_vm5, %v4842_v31  ;;  %3874 = vmatmul.mubr.msk.f32.gmra.mxu0 %vm1478_vm5, %v4830_v7  ;;  %v1304_v7 = vpop.permute.xlu1 %1303 }
 0x16a   : > { %3876 = vmatprep.mubr.msk.f32.mxu0 %vm1478_vm5, %v4842_v31  ;;  %v1448_v26 = vsel %vm1115_vm1, %v1184_v21, %v1304_v7 }
 0x16c   : > { %3844 = vmatmul.mubr.msk.f32.gmra.mxu1 %vm1478_vm5, %v4848_v41 }
 0x16d   : > { %3846 = vmatprep.mubr.msk.f32.mxu1 %vm1478_vm5, %v1468_v58  ;;  %3877 = vmatmul.mubr.msk.f32.gmra.mxu0 %vm1478_vm5, %v4848_v41  ;;  %v1400_v27 = vpop.permute.xlu1 %1399 }
 0x16e   : > { %3879 = vmatprep.mubr.msk.f32.mxu0 %vm1478_vm5, %v1468_v58  ;;  %v1473_v28 = vsel %vm1449_vm4, %v1448_v26, %v1400_v27 }
 0x170   : > { %3847 = vmatmul.mubr.msk.f32.gmra.mxu1 %vm1478_vm5, %v1469_v1 }
 0x171   : > { %3849 = vmatprep.mubr.msk.f32.mxu1 %vm1478_vm5, %v1470_v17  ;;  %3880 = vmatmul.mubr.msk.f32.gmra.mxu0 %vm1478_vm5, %v1469_v1 }
 0x172   : > { %3882 = vmatprep.mubr.msk.f32.mxu0 %vm1478_vm5, %v1470_v17 }
 0x174   : > { %3850 = vmatmul.mubr.msk.f32.gmra.mxu1 %vm1478_vm5, %v1471_v24 }
 0x175   : > { %3883 = vmatmul.mubr.msk.f32.gmra.mxu0 %vm1478_vm5, %v1471_v24 }
 0x176   : > { %3885 = vmatprep.mubr.msk.f32.mxu0 %vm1478_vm5, %v1472_v25 }
 0x179   : > { %3886 = vmatmul.mubr.msk.f32.gmra.mxu0 %vm1478_vm5, %v1473_v28 }
 0x1cc   : > { %v4936_v30 = vpop.f32.mrf.mxu1 }
 0x1ce   : > { %v4938_v31 = vpop.f32.mrf.mxu1 }
 0x1d4   : > { %v3788_v33 = vpop.f32.mrf.mxu0 }
 0x1d5   : > { %v1711_v58 = vadd.f32 %v3788_v33, %v4959_v56 }
 0x1d6   : > { %v1605_v37 = vpop.f32.mrf.mxu0 }
 0x1d7   : > { %v1710_v61 = vadd.f32 %v4959_v56, %v1605_v37 }
 0x1dc   : > { %v4940_v36 = vpop.f32.mrf.mxu1 }
 0x1de   : > { %v4942_v40 = vpop.f32.mrf.mxu1 }
 0x1e4   : > { %v3791_v41 = vpop.f32.mrf.mxu0 }
 0x1e5   : > { %v1713_v3 = vadd.f32 %v3791_v41, %v4959_v56 }
 0x1e6   : > { %v1615_v45 = vpop.f32.mrf.mxu0 }
 0x1e7   : > { %v1712_v10 = vadd.f32 %v4959_v56, %v1615_v45 }
 0x1ec   : > { %v4944_v44 = vpop.f32.mrf.mxu1 }
 0x1ee   : > { %v4946_v46 = vpop.f32.mrf.mxu1 }
 0x1f4   : > { %v3794_v35 = vpop.f32.mrf.mxu0 }
 0x1f5   : > { %v1715_v23 = vadd.f32 %v3794_v35, %v4959_v56 }
 0x1f6   : > { %v1625_v49 = vpop.f32.mrf.mxu0 }
 0x1f7   : > { %v1714_v17 = vadd.f32 %v4959_v56, %v1625_v49 }
 0x1fc   : > { %v4948_v48 = vpop.f32.mrf.mxu1 }
 0x1fe   : > { %v4950_v50 = vpop.f32.mrf.mxu1 }
 0x204   : > { %v3797_v53 = vpop.f32.mrf.mxu0 }
 0x205   : > { %v1717_v28 = vadd.f32 %v3797_v53, %v4959_v56 }
 0x206   : > { %v1635_v38 = vpop.f32.mrf.mxu0 }
 0x20c   : > { %v4952_v39 = vpop.f32.mrf.mxu1 }
 0x20e   : > { %v4954_v42 = vpop.f32.mrf.mxu1 }
 0x210   : > { %v3824_v55 = vpop.f32.mrf.mxu1 }
 0x211   : > { %v3800_v51 = vpop.f32.mrf.mxu0  ;;  %v1906_v63 = vadd.f32 %v3824_v55, %v1711_v58  ;;  %v1716_v58 = vadd.f32 %v4959_v56, %v1635_v38 }
 0x212   : > { %v1806_v59 = vpop.f32.mrf.mxu1 }
 0x213   : > { %v1645_v60 = vpop.f32.mrf.mxu0  ;;  %v1905_v43 = vadd.f32 %v1806_v59, %v1710_v61 }
 0x214   : > { %v3827_v1 = vpop.f32.mrf.mxu1 }
 0x215   : > { %v3860_v2 = vpop.f32.mrf.mxu0  ;;  %v1908_v57 = vadd.f32 %v3827_v1, %v1713_v3 }
 0x216   : > { %v2101_v4 = vadd.f32 %v3860_v2, %v1906_v63  ;;  %v1816_v5 = vpop.f32.mrf.mxu1 }
 0x217   : > { %v2001_v6 = vpop.f32.mrf.mxu0  ;;  %v1907_v34 = vadd.f32 %v1816_v5, %v1712_v10 }
 0x218   : > { %v2121_v62 = vmul.f32 %v4476_v8, %v2101_v4  ;;  %v2100_v15 = vadd.f32 %v2001_v6, %v1905_v43  ;;  %v3830_v11 = vpop.f32.mrf.mxu1  ;;  %v1719_v43 = vadd.f32 %v3800_v51, %v4959_v56 }
 0x219   : > { %v3863_v52 = vpop.f32.mrf.mxu0  ;;  %v1910_v18 = vadd.f32 %v3830_v11, %v1715_v23 }
 0x21a   : > { %v2141_v54 = vadd.f32 %v4481_v9, %v2121_v62  ;;  %v2120_v47 = vmul.f32 %v4476_v8, %v2100_v15  ;;  %v2103_v7 = vadd.f32 %v3863_v52, %v1908_v57  ;;  %v1826_v16 = vpop.f32.mrf.mxu1  ;;  %v1718_v15 = vadd.f32 %v4959_v56, %v1645_v60 }
 0x21b   : > { %v2011_v20 = vpop.f32.mrf.mxu0  ;;  %v1909_v33 = vadd.f32 %v1826_v16, %v1714_v17 }
 0x21c   : > { %v2161_v21 = vmax.f32 %v2141_v54, 0.0  ;;  %v2140_v24 = vadd.f32 %v4481_v9, %v2120_v47  ;;  %v2123_v25 = vmul.f32 %v4476_v8, %v2103_v7  ;;  %v2102_v26 = vadd.f32 %v2011_v20, %v1907_v34  ;;  %v3833_v27 = vpop.f32.mrf.mxu1 }
 0x21d   : > { %v3866_v37 = vpop.f32.mrf.mxu0  ;;  %v1912_v59 = vadd.f32 %v3833_v27, %v1717_v28  ;;  %v1721_v7 = vadd.f32 %v4936_v30, %v4959_v56 }
 0x21e   : > { %2181 = vst.msk [vmem:[#allocation2 + $0x9] sm:$0xff] %vm1115_vm1, %v2161_v21  ;;  %v2160_v41 = vmax.f32 %v2140_v24, 0.0  ;;  %v2143_v45 = vadd.f32 %v4481_v9, %v2123_v25  ;;  %v2122_v35 = vmul.f32 %v4476_v8, %v2102_v26  ;;  %v2105_v49 = vadd.f32 %v3866_v37, %v1910_v18  ;;  %v1836_v55 = vpop.f32.mrf.mxu1 }
 0x21f   : > { %v2021_v61 = vpop.f32.mrf.mxu0  ;;  %v1911_v4 = vadd.f32 %v1836_v55, %v1716_v58  ;;  %v1720_v25 = vadd.f32 %v4959_v56, %v4938_v31 }
 0x220   : > { %2180 = vst.msk [vmem:[#allocation2 + $0x1] sm:$0xff] %vm1115_vm1, %v2160_v41  ;;  %v2163_v63 = vmax.f32 %v2143_v45, 0.0  ;;  %v2142_v53 = vadd.f32 %v4481_v9, %v2122_v35  ;;  %v2125_v1 = vmul.f32 %v4476_v8, %v2105_v49  ;;  %v2104_v2 = vadd.f32 %v2021_v61, %v1909_v33  ;;  %v3836_v3 = vpop.f32.mrf.mxu1 }
 0x221   : > { %v3869_v5 = vpop.f32.mrf.mxu0  ;;  %v1914_v11 = vadd.f32 %v3836_v3, %v1719_v43  ;;  %v1723_v45 = vadd.f32 %v4940_v36, %v4959_v56 }
 0x222   : > { %2183 = vst.msk [vmem:[#allocation2 + $0x21] sm:$0xff] %vm1115_vm1, %v2163_v63  ;;  %v2162_v6 = vmax.f32 %v2142_v53, 0.0  ;;  %v2145_v38 = vadd.f32 %v4481_v9, %v2125_v1  ;;  %v2124_v10 = vmul.f32 %v4476_v8, %v2104_v2  ;;  %v2107_v57 = vadd.f32 %v3869_v5, %v1912_v59  ;;  %v1846_v62 = vpop.f32.mrf.mxu1 }
 0x223   : > { %v2031_v23 = vpop.f32.mrf.mxu0  ;;  %v1913_v16 = vadd.f32 %v1846_v62, %v1718_v15  ;;  %v1722_v63 = vadd.f32 %v4959_v56, %v4942_v40  ;;  %v1725_v5 = vadd.f32 %v4944_v44, %v4959_v56 }
 0x224   : > { %2182 = vst.msk [vmem:[#allocation2 + $0x19] sm:$0xff] %vm1115_vm1, %v2162_v6  ;;  %v2165_v52 = vmax.f32 %v2145_v38, 0.0  ;;  %v2144_v51 = vadd.f32 %v4481_v9, %v2124_v10  ;;  %v2127_v54 = vmul.f32 %v4476_v8, %v2107_v57  ;;  %v2106_v34 = vadd.f32 %v2031_v23, %v1911_v4  ;;  %v3839_v47 = vpop.f32.mrf.mxu1 }
 0x225   : > { %v3872_v17 = vpop.f32.mrf.mxu0  ;;  %v1916_v26 = vadd.f32 %v3839_v47, %v1721_v7  ;;  %v1727_v7 = vadd.f32 %v4948_v48, %v4959_v56 }
 0x226   : > { %2185 = vst.msk [vmem:[#allocation2 + $0x39] sm:$0xff] %vm1115_vm1, %v2165_v52  ;;  %v2164_v18 = vmax.f32 %v2144_v51, 0.0  ;;  %v2147_v60 = vadd.f32 %v4481_v9, %v2127_v54  ;;  %v2126_v20 = vmul.f32 %v4476_v8, %v2106_v34  ;;  %v2109_v21 = vadd.f32 %v3872_v17, %v1914_v11  ;;  %v1856_v24 = vpop.f32.mrf.mxu1 }
 0x227   : > { %v2041_v27 = vpop.f32.mrf.mxu0  ;;  %v1915_v35 = vadd.f32 %v1856_v24, %v1720_v25  ;;  %v1724_v11 = vadd.f32 %v4959_v56, %v4946_v46  ;;  %v1726_v24 = vadd.f32 %v4959_v56, %v4950_v50 }
 0x228   : > { %2184 = vst.msk [vmem:[#allocation2 + $0x31] sm:$0xff] %vm1115_vm1, %v2164_v18  ;;  %v2167_v28 = vmax.f32 %v2147_v60, 0.0  ;;  %v2146_v30 = vadd.f32 %v4481_v9, %v2126_v20  ;;  %v2129_v33 = vmul.f32 %v4476_v8, %v2109_v21  ;;  %v2108_v37 = vadd.f32 %v2041_v27, %v1913_v16  ;;  %v3842_v41 = vpop.f32.mrf.mxu1 }
 0x229   : > { %v3875_v49 = vpop.f32.mrf.mxu0  ;;  %v1918_v53 = vadd.f32 %v3842_v41, %v1723_v45 }
 0x22a   : > { %2187 = vst.msk [vmem:[#allocation2 + $0x51] sm:$0xff] %vm1115_vm1, %v2167_v28  ;;  %v2166_v55 = vmax.f32 %v2146_v30, 0.0  ;;  %v2149_v31 = vadd.f32 %v4481_v9, %v2129_v33  ;;  %v2128_v58 = vmul.f32 %v4476_v8, %v2108_v37  ;;  %v2111_v59 = vadd.f32 %v3875_v49, %v1916_v26  ;;  %v1866_v61 = vpop.f32.mrf.mxu1 }
 0x22b   : > { %v2051_v1 = vpop.f32.mrf.mxu0  ;;  %v1917_v6 = vadd.f32 %v1866_v61, %v1722_v63  ;;  %v1729_v37 = vadd.f32 %v4952_v39, %v4959_v56 }
 0x22c   : > { %2186 = vst.msk [vmem:[#allocation2 + $0x49] sm:$0xff] %vm1115_vm1, %v2166_v55  ;;  %v2169_v2 = vmax.f32 %v2149_v31, 0.0  ;;  %v2148_v36 = vadd.f32 %v4481_v9, %v2128_v58  ;;  %v2131_v3 = vmul.f32 %v4476_v8, %v2111_v59  ;;  %v2110_v43 = vadd.f32 %v2051_v1, %v1915_v35  ;;  %v3845_v4 = vpop.f32.mrf.mxu1 }
 0x22d   : > { %v3878_v38 = vpop.f32.mrf.mxu0  ;;  %v1920_v23 = vadd.f32 %v3845_v4, %v1725_v5  ;;  %v1728_v58 = vadd.f32 %v4959_v56, %v4954_v42 }
 0x22e   : > { %2189 = vst.msk [vmem:[#allocation2 + $0x69] sm:$0xff] %vm1115_vm1, %v2169_v2  ;;  %v2168_v10 = vmax.f32 %v2148_v36, 0.0  ;;  %v2151_v40 = vadd.f32 %v4481_v9, %v2131_v3  ;;  %v2130_v57 = vmul.f32 %v4476_v8, %v2110_v43  ;;  %v2113_v62 = vadd.f32 %v3878_v38, %v1918_v53  ;;  %v1876_v15 = vpop.f32.mrf.mxu1 }
 0x22f   : > { %v2061_v52 = vpop.f32.mrf.mxu0  ;;  %v1919_v16 = vadd.f32 %v1876_v15, %v1724_v11 }
 0x230   : > { %2188 = vst.msk [vmem:[#allocation2 + $0x61] sm:$0xff] %vm1115_vm1, %v2168_v10  ;;  %v2171_v51 = vmax.f32 %v2151_v40, 0.0  ;;  %v2150_v44 = vadd.f32 %v4481_v9, %v2130_v57  ;;  %v2133_v54 = vmul.f32 %v4476_v8, %v2113_v62  ;;  %v2112_v34 = vadd.f32 %v2061_v52, %v1917_v6  ;;  %v3848_v47 = vpop.f32.mrf.mxu1 }
 0x231   : > { %v3881_v17 = vpop.f32.mrf.mxu0  ;;  %v1922_v25 = vadd.f32 %v3848_v47, %v1727_v7 }
 0x232   : > { %2191 = vst.msk [vmem:[#allocation2 + $0x81] sm:$0xff] %vm1115_vm1, %v2171_v51  ;;  %v2170_v18 = vmax.f32 %v2150_v44, 0.0  ;;  %v2153_v46 = vadd.f32 %v4481_v9, %v2133_v54  ;;  %v2132_v60 = vmul.f32 %v4476_v8, %v2112_v34  ;;  %v2115_v20 = vadd.f32 %v3881_v17, %v1920_v23  ;;  %v1886_v21 = vpop.f32.mrf.mxu1 }
 0x233   : > { %v2071_v26 = vpop.f32.mrf.mxu0  ;;  %v1921_v41 = vadd.f32 %v1886_v21, %v1726_v24 }
 0x234   : > { %2190 = vst.msk [vmem:[#allocation2 + $0x79] sm:$0xff] %vm1115_vm1, %v2170_v18  ;;  %v2173_v27 = vmax.f32 %v2153_v46, 0.0  ;;  %v2152_v48 = vadd.f32 %v4481_v9, %v2132_v60  ;;  %v2135_v28 = vmul.f32 %v4476_v8, %v2115_v20  ;;  %v2114_v30 = vadd.f32 %v2071_v26, %v1919_v16  ;;  %v3851_v33 = vpop.f32.mrf.mxu1 }
 0x235   : > { %v3884_v45 = vpop.f32.mrf.mxu0  ;;  %v1924_v59 = vadd.f32 %v3851_v33, %v1729_v37 }
 0x236   : > { %2193 = vst.msk [vmem:[#allocation2 + $0x99] sm:$0xff] %vm1115_vm1, %v2173_v27  ;;  %v2172_v35 = vmax.f32 %v2152_v48, 0.0  ;;  %v2155_v50 = vadd.f32 %v4481_v9, %v2135_v28  ;;  %v2134_v49 = vmul.f32 %v4476_v8, %v2114_v30  ;;  %v2117_v55 = vadd.f32 %v3884_v45, %v1922_v25  ;;  %v1896_v31 = vpop.f32.mrf.mxu1 }
 0x237   : > { %v2081_v61 = vpop.f32.mrf.mxu0  ;;  %v1923_v2 = vadd.f32 %v1896_v31, %v1728_v58 }
 0x238   : > { %2192 = vst.msk [vmem:[#allocation2 + $0x91] sm:$0xff] %vm1115_vm1, %v2172_v35  ;;  %v2175_v63 = vmax.f32 %v2155_v50, 0.0  ;;  %v2154_v39 = vadd.f32 %v4481_v9, %v2134_v49  ;;  %v2137_v53 = vmul.f32 %v4476_v8, %v2117_v55  ;;  %v2116_v1 = vadd.f32 %v2081_v61, %v1921_v41 }
 0x239   : > { %v3887_v36 = vpop.f32.mrf.mxu0 }
 0x23a   : > { %2195 = vst.msk [vmem:[#allocation2 + $0xb1] sm:$0xff] %vm1115_vm1, %v2175_v63  ;;  %v2174_v3 = vmax.f32 %v2154_v39, 0.0  ;;  %v2157_v43 = vadd.f32 %v4481_v9, %v2137_v53  ;;  %v2136_v4 = vmul.f32 %v4476_v8, %v2116_v1  ;;  %v2119_v42 = vadd.f32 %v3887_v36, %v1924_v59 }
 0x23b   : > { %v2091_v56 = vpop.f32.mrf.mxu0 }
 0x23c   : > { %2194 = vst.msk [vmem:[#allocation2 + $0xa9] sm:$0xff] %vm1115_vm1, %v2174_v3  ;;  %v2177_v5 = vmax.f32 %v2157_v43, 0.0  ;;  %v2156_v6 = vadd.f32 %v4481_v9, %v2136_v4  ;;  %v2139_v38 = vmul.f32 %v4476_v8, %v2119_v42  ;;  %v2118_v10 = vadd.f32 %v2091_v56, %v1923_v2 }
 0x23e   : > { %2197 = vst.msk [vmem:[#allocation2 + $0xc9] sm:$0xff] %vm1115_vm1, %v2177_v5  ;;  %v2176_v40 = vmax.f32 %v2156_v6, 0.0  ;;  %v2159_v57 = vadd.f32 %v4481_v9, %v2139_v38  ;;  %v2138_v62 = vmul.f32 %v4476_v8, %v2118_v10 }
 0x240   : > { %2196 = vst.msk [vmem:[#allocation2 + $0xc1] sm:$0xff] %vm1115_vm1, %v2176_v40  ;;  %v2179_v15 = vmax.f32 %v2159_v57, 0.0  ;;  %v2158_v11 = vadd.f32 %v4481_v9, %v2138_v62  ;;  %2202 = sbr.rel (%p3497_p8) target bundleno = 584 (0x248), region = 68 }
 0x242   : > { %2199 = vst.msk [vmem:[#allocation2 + $0xe1] sm:$0xff] %vm1115_vm1, %v2179_v15  ;;  %v2178_v23 = vmax.f32 %v2158_v11, 0.0 }
 0x244   : > { %2198 = vst.msk [vmem:[#allocation2 + $0xd9] sm:$0xff] %vm1115_vm1, %v2178_v23 }
 0x245   : > { %vm2205_vm6 = vcmask 58368   ;;  %v4266_v52 = vmov 0.0  }
 0x246   : > { %2203 = vst.msk [vmem:[#allocation2] sm:$0xff] %vm1115_vm1, %v4266_v52  ;;  %2204 = vst.msk [vmem:[#allocation2 + $0x8] sm:$0xff] %vm1115_vm1, %v4266_v52 }
 0x247   : > { %2206 = vst.msk [vmem:[#allocation2 + $0x10] sm:$0x3] %vm2205_vm6, %v4266_v52 }
 0x248 PF: > { %2209 = sbr.rel (%p3498_p0) target bundleno = 592 (0x250), region = 72 }
 0x24d   : > { %vm2213_vm7 = vcmask 58368   ;;  %v4267_v8 = vmov 0.0  }
 0x24e   : > { %2211 = vst.msk [vmem:[#allocation2 + $0xd8] sm:$0xff] %vm1115_vm1, %v4267_v8  ;;  %2212 = vst.msk [vmem:[#allocation2 + $0xe0] sm:$0xff] %vm1115_vm1, %v4267_v8 }
 0x24f   : > { %2214 = vst.msk [vmem:[#allocation2 + $0xe8] sm:$0x3] %vm2213_vm7, %v4267_v8 }
 0x250 PF: > { %v5059_v9 = vld [vmem:[#allocation2 + $0xc8] sm:$0xff]  ;;  %v2241_v51 = vld [vmem:[#allocation2 + $0xd0] sm:$0x3]  ;;  %vm2275_vm8 = vcmask 1046528   ;;  %vm2386_vm9 = vcmask 1045504   ;;  %3888 = vmatprep.subr.mxu1 %v4259_v0  ;;  %3923 = vmatprep.subr.mxu0 %v4259_v0  ;;  %v5079_v28 = vld [vmem:[#allocation2 + $0xc0] sm:$0xff] }
 0x251   : > { %v5061_v44 = vld [vmem:[#allocation2 + $0xb0] sm:$0xff]  ;;  %v2317_v54 = vrot.slane %v5059_v9, 1  ;;  %v2319_v34 = vrot.slane %v2241_v51, 1  ;;  %v2238_v47 = vld [vmem:[#allocation2 + $0xb8] sm:$0x3]  ;;  %v2428_v16 = vrot.slane %v5059_v9, 2 }
 0x252   : > { %v2312_v7 = vrot.slane %v5061_v44, 1  ;;  %v2314_v17 = vrot.slane %v2238_v47, 1  ;;  %v2430_v18 = vrot.slane %v2241_v51, 2  ;;  %v2423_v46 = vrot.slane %v5061_v44, 2  ;;  %v5069_v20 = vld [vmem:[#allocation2 + $0xa8] sm:$0xff]  ;;  %v5087_v45 = vld [vmem:[#allocation2 + $0x98] sm:$0xff] }
 0x253   : > { %v2425_v60 = vrot.slane %v2238_v47, 2  ;;  %v2320_v21 = vsel %vm2275_vm8, %v2317_v54, %v2319_v34  ;;  %v2422_v26 = vrot.slane %v5069_v20, 2  ;;  %v2311_v48 = vrot.slane %v5069_v20, 1  ;;  %v2235_v35 = vld [vmem:[#allocation2 + $0xa0] sm:$0x3]  ;;  %v5095_v61 = vld [vmem:[#allocation2 + $0x90] sm:$0xff] }
 0x254   : > { %2360 = vrot.lane.b32.xlu1 %v2320_v21, %s4265_s18  ;;  %v2315_v24 = vsel %vm2275_vm8, %v2312_v7, %v2314_v17  ;;  %v2431_v25 = vsel %vm2386_vm9, %v2428_v16, %v2430_v18  ;;  %v2427_v33 = vrot.slane %v5079_v28, 2  ;;  %v2316_v41 = vrot.slane %v5079_v28, 1  ;;  %v5103_v2 = vld [vmem:[#allocation2 + $0x80] sm:$0xff]  ;;  %v2232_v36 = vld [vmem:[#allocation2 + $0x88] sm:$0x3]  ;;  %v5111_v6 = vld [vmem:[#allocation2 + $0x78] sm:$0xff] }
 0x255   : > { %2356 = vrot.lane.b32.xlu0 %v2315_v24, %s4265_s18  ;;  %v2426_v27 = vsel %vm2386_vm9, %v2423_v46, %v2425_v60  ;;  %v2424_v30 = vsel %vm2386_vm9, %v2422_v26, %v2423_v46  ;;  %v2313_v37 = vsel %vm2275_vm8, %v2311_v48, %v2312_v7  ;;  %v2418_v49 = vrot.slane %v5087_v45, 2  ;;  %v5119_v62 = vld [vmem:[#allocation2 + $0x68] sm:$0xff]  ;;  %v2229_v15 = vld [vmem:[#allocation2 + $0x70] sm:$0x3]  ;;  %v5127_v34 = vld [vmem:[#allocation2 + $0x60] sm:$0xff]  ;;  %s3639_s22 = sshll.u32 %s4242_s9, 1 }
 0x256   : > { %v2429_v50 = vsel %vm2386_vm9, %v2427_v33, %v2428_v16  ;;  %v2420_v55 = vrot.slane %v2235_v35, 2  ;;  %v2318_v31 = vsel %vm2275_vm8, %v2316_v41, %v2317_v54  ;;  %v2307_v58 = vrot.slane %v5087_v45, 1  ;;  %v5135_v18 = vld [vmem:[#allocation2 + $0x50] sm:$0xff]  ;;  %v2226_v46 = vld [vmem:[#allocation2 + $0x58] sm:$0x3]  ;;  %v5143_v48 = vld [vmem:[#allocation2 + $0x48] sm:$0xff]  ;;  %s3398_s23 = sadd.s32 %s4238_s30, %s3639_s22 }
 0x257   : > { %v2309_v59 = vrot.slane %v2235_v35, 1  ;;  %v2417_v39 = vrot.slane %v5095_v61, 2  ;;  %v2306_v1 = vrot.slane %v5095_v61, 1  ;;  %v2413_v43 = vrot.slane %v5103_v2, 2  ;;  %v5151_v35 = vld [vmem:[#allocation2 + $0x38] sm:$0xff]  ;;  %s3640_s19 = sshll.u32 %s3398_s23, 6 }
 0x258   : > { %2471 = vrot.lane.b32.xlu1 %v2431_v25, %s4264_s14  ;;  %v2421_v63 = vsel %vm2386_vm9, %v2418_v49, %v2420_v55  ;;  %v2415_v4 = vrot.slane %v2232_v36, 2  ;;  %v2302_v56 = vrot.slane %v5103_v2, 1  ;;  %v2304_v5 = vrot.slane %v2232_v36, 1  ;;  %s3402_s15 = sshll.u32 %s4681_s13, 4  ;;  %s3387_s11 = scalar_lea.sflag [#allocation5], %s4414_s16  ;;  %s3403_s15 = int_to_ptr.vmem [resolvable:$true] %s3402_s15 }
 0x259   : > { %2467 = vrot.lane.b32.xlu0 %v2426_v27, %s4264_s14  ;;  %v2310_v53 = vsel %vm2275_vm8, %v2307_v58, %v2309_v59  ;;  %v2419_v3 = vsel %vm2386_vm9, %v2417_v39, %v2418_v49  ;;  %v2308_v42 = vsel %vm2275_vm8, %v2306_v1, %v2307_v58  ;;  %v2412_v10 = vrot.slane %v5111_v6, 2  ;;  %v5159_v39 = vld [vmem:[#allocation2 + $0x30] sm:$0xff]  ;;  %s4158_s9 = scalar_lea.vmem %s3403_s15, 64  ;;  %s4270_s30 = smov [#allocation6]  }
 0x25a   : > { %v2416_v38 = vsel %vm2386_vm9, %v2413_v43, %v2415_v4  ;;  %v2305_v40 = vsel %vm2275_vm8, %v2302_v56, %v2304_v5  ;;  %v2301_v57 = vrot.slane %v5111_v6, 1  ;;  %v2408_v23 = vrot.slane %v5119_v62, 2  ;;  %v2220_v4 = vld [vmem:[#allocation2 + $0x28] sm:$0x3]  ;;  %p4159_p2 = scmp.ne.s32.totalorder %s3403_s15, %s4158_s9  ;;  %s4162_s24 = sshll.u32 %s4270_s30, 4  ;;  %s4163_s24 = int_to_ptr.vmem [resolvable:$false] %s4162_s24 }
 0x25b   : > { %v2414_v11 = vsel %vm2386_vm9, %v2412_v10, %v2413_v43  ;;  %v2410_v52 = vrot.slane %v2229_v15, 2  ;;  %v2297_v51 = vrot.slane %v5119_v62, 1  ;;  %v2299_v54 = vrot.slane %v2229_v15, 1  ;;  %v5167_v43 = vld [vmem:[#allocation2 + $0x20] sm:$0xff]  ;;  %s4164_s27 = scalar_lea.vmem %s4163_s24, 128  ;;  %p4165_p5 = scmp.lt.s32.totalorder %s3403_s15, %s4163_s24 }
 0x25c   : > { %2465 = vrot.lane.b32.xlu1 %v2424_v30, %s4264_s14  ;;  %v2303_v8 = vsel %vm2275_vm8, %v2301_v57, %v2302_v56  ;;  %v2407_v7 = vrot.slane %v5127_v34, 2  ;;  %v2296_v17 = vrot.slane %v5127_v34, 1  ;;  %v2403_v21 = vrot.slane %v5135_v18, 2  ;;  %v5175_v57 = vld [vmem:[#allocation2 + $0x18] sm:$0xff]  ;;  %p4160_p3 = pnand %p4159_p2, %p4381_p9  ;;  %p4166_p6 = scmp.lt.s32.totalorder %s4164_s27, %s4158_s9 }
 0x25d   : > { %2354 = vrot.lane.b32.xlu0 %v2313_v37, %s4265_s18  ;;  %v2411_v47 = vsel %vm2386_vm9, %v2408_v23, %v2410_v52  ;;  %v2300_v16 = vsel %vm2275_vm8, %v2297_v51, %v2299_v54  ;;  %v2405_v24 = vrot.slane %v2226_v46, 2  ;;  %v2292_v26 = vrot.slane %v5135_v18, 1 }
 0x25e   : > { %v2409_v60 = vsel %vm2386_vm9, %v2407_v7, %v2408_v23  ;;  %v2298_v25 = vsel %vm2275_vm8, %v2296_v17, %v2297_v51  ;;  %v2294_v27 = vrot.slane %v2226_v46, 1  ;;  %v2402_v33 = vrot.slane %v5143_v48, 2  ;;  %v2217_v51 = vld [vmem:[#allocation2 + $0x10] sm:$0x3]  ;;  %p4161_p4 = pneg %p4160_p3  ;;  %p4167_p7 = por %p4166_p6, %p4165_p5 }
 0x25f   : > { %v2406_v30 = vsel %vm2386_vm9, %v2403_v21, %v2405_v24  ;;  %v2291_v41 = vrot.slane %v5143_v48, 1  ;;  %v2398_v55 = vrot.slane %v5151_v35, 2  ;;  %v2287_v59 = vrot.slane %v5151_v35, 1 }
 0x260   : > { %2469 = vrot.lane.b32.xlu1 %v2429_v50, %s4264_s14  ;;  %v2295_v37 = vsel %vm2275_vm8, %v2292_v26, %v2294_v27  ;;  %v2223_v50 = vld [vmem:[#allocation2 + $0x40] sm:$0x3]  ;;  %v2404_v49 = vsel %vm2386_vm9, %v2402_v33, %v2403_v21  ;;  %v2397_v1 = vrot.slane %v5159_v39, 2  ;;  %v2393_v56 = vrot.slane %v5167_v43, 2  ;;  %p4168_p10 = pnand %p4167_p7, %p4161_p4 }
 0x261   : > { %2358 = vrot.lane.b32.xlu0 %v2318_v31, %s4265_s18  ;;  %v2400_v31 = vrot.slane %v2223_v50, 2  ;;  %v2293_v58 = vsel %vm2275_vm8, %v2291_v41, %v2292_v26  ;;  %v2395_v5 = vrot.slane %v2220_v4, 2  ;;  %v2282_v10 = vrot.slane %v5167_v43, 1  ;;  %v5203_v27 = vld [vmem:[#allocation2 + $0xe0] sm:$0xff] }
 0x262   : > { %v2281_v52 = vrot.slane %v5175_v57, 1  ;;  %v2390_v7 = vrot.slane %v2217_v51, 2  ;;  %v2279_v46 = vrot.slane %v2217_v51, 1  ;;  %vm4268_vm10 = vmmov 0  }
 0x263   : > { %v2396_v15 = vsel %vm2386_vm9, %v2393_v56, %v2395_v5  ;;  %3920 = vmatprep.mubr.msk.f32.mxu1 %vm4268_vm10, %v4259_v0  ;;  %3955 = vmatprep.mubr.msk.f32.mxu0 %vm4268_vm10, %v4259_v0  ;;  %v4269_v51 = vmov 0  }
 0x264   : > { %2463 = vrot.lane.b32.xlu1 %v2421_v63, %s4264_s14  ;;  %v2289_v63 = vrot.slane %v2223_v50, 1  ;;  %4129 = vset.pattern.permute.xlu0 %v4269_v51 }
 0x265   : > { %2352 = vrot.lane.b32.xlu0 %v2310_v53, %s4265_s18  ;;  %v2401_v53 = vsel %vm2386_vm9, %v2398_v55, %v2400_v31  ;;  %v5211_v31 = vld [vmem:[#allocation2 + $0xd8] sm:$0xff] }
 0x266   : > { %v2290_v36 = vsel %vm2275_vm8, %v2287_v59, %v2289_v63 }
 0x268   : > { %2461 = vrot.lane.b32.xlu1 %v2419_v3, %s4264_s14  ;;  %v2286_v3 = vrot.slane %v5159_v39, 1 }
 0x269   : > { %2350 = vrot.lane.b32.xlu0 %v2308_v42, %s4265_s18  ;;  %v2399_v42 = vsel %vm2386_vm9, %v2397_v1, %v2398_v55 }
 0x26c   : > { %2459 = vrot.lane.b32.xlu1 %v2416_v38, %s4264_s14  ;;  %v2288_v38 = vsel %vm2275_vm8, %v2286_v3, %v2287_v59  ;;  %v2432_v59 = vrot.slane %v5211_v31, 2 }
 0x26d   : > { %2348 = vrot.lane.b32.xlu0 %v2305_v40, %s4265_s18  ;;  %v2284_v40 = vrot.slane %v2220_v4, 1 }
 0x26f   : > { %v2285_v23 = vsel %vm2275_vm8, %v2282_v10, %v2284_v40 }
 0x270   : > { %2457 = vrot.lane.b32.xlu1 %v2414_v11, %s4264_s14  ;;  %v2392_v11 = vrot.slane %v5175_v57, 2 }
 0x271   : > { %2346 = vrot.lane.b32.xlu0 %v2303_v8, %s4265_s18  ;;  %v5183_v8 = vld [vmem:[#allocation2 + $0x8] sm:$0xff] }
 0x272   : > { %v2394_v54 = vsel %vm2386_vm9, %v2392_v11, %v2393_v56  ;;  %v2277_v17 = vrot.slane %v5183_v8, 1 }
 0x274   : > { %2455 = vrot.lane.b32.xlu1 %v2411_v47, %s4264_s14  ;;  %v2388_v47 = vrot.slane %v5183_v8, 2 }
 0x275   : > { %2344 = vrot.lane.b32.xlu0 %v2300_v16, %s4265_s18  ;;  %v2283_v16 = vsel %vm2275_vm8, %v2281_v52, %v2282_v10 }
 0x276   : > { %v2391_v21 = vsel %vm2386_vm9, %v2388_v47, %v2390_v7 }
 0x278   : > { %2453 = vrot.lane.b32.xlu1 %v2409_v60, %s4264_s14  ;;  %v5191_v60 = vld [vmem:[#allocation2] sm:$0xff] }
 0x279   : > { %2342 = vrot.lane.b32.xlu0 %v2298_v25, %s4265_s18  ;;  %v2387_v24 = vrot.slane %v5191_v60, 2  ;;  %v2280_v25 = vsel %vm2275_vm8, %v2277_v17, %v2279_v46  ;;  %v2276_v26 = vrot.slane %v5191_v60, 1 }
 0x27b   : > { %v2389_v33 = vsel %vm2386_vm9, %v2387_v24, %v2388_v47  ;;  %v2278_v50 = vsel %vm2275_vm8, %v2276_v26, %v2277_v17 }
 0x27c   : > { %2451 = vrot.lane.b32.xlu1 %v2406_v30, %s4264_s14  ;;  %v2244_v30 = vld [vmem:[#allocation2 + $0xe8] sm:$0x3] }
 0x27d   : > { %2340 = vrot.lane.b32.xlu0 %v2295_v37, %s4265_s18  ;;  %v2433_v37 = vrot.slane %v5203_v27, 2  ;;  %v2435_v41 = vrot.slane %v2244_v30, 2  ;;  %v2324_v55 = vrot.slane %v2244_v30, 1 }
 0x27f   : > { %v2434_v1 = vsel %vm2386_vm9, %v2432_v59, %v2433_v37 }
 0x280   : > { %2449 = vrot.lane.b32.xlu1 %v2404_v49, %s4264_s14  ;;  %v2322_v49 = vrot.slane %v5203_v27, 1 }
 0x281   : > { %2338 = vrot.lane.b32.xlu0 %v2293_v58, %s4265_s18  ;;  %v2436_v58 = vsel %vm2386_vm9, %v2433_v37, %v2435_v41 }
 0x282   : > { %v2325_v63 = vsel %vm2275_vm8, %v2322_v49, %v2324_v55 }
 0x284   : > { %2447 = vrot.lane.b32.xlu1 %v2401_v53, %s4264_s14  ;;  %v2321_v53 = vrot.slane %v5211_v31, 1 }
 0x285   : > { %2336 = vrot.lane.b32.xlu0 %v2290_v36, %s4265_s18 }
 0x286   : > { %v2323_v36 = vsel %vm2275_vm8, %v2321_v53, %v2322_v49  ;;  %v2981_v53 = vcombine.high %v4501_v19, %v4501_v19 }
 0x288   : > { %2445 = vrot.lane.b32.xlu1 %v2399_v42, %s4264_s14 }
 0x289   : > { %2334 = vrot.lane.b32.xlu0 %v2288_v38, %s4265_s18 }
 0x28c   : > { %2443 = vrot.lane.b32.xlu1 %v2396_v15, %s4264_s14 }
 0x28d   : > { %2332 = vrot.lane.b32.xlu0 %v2285_v23, %s4265_s18  ;;  %v2537_v23 = vld [vmem:[%s5639_s5] sm:$0xf] }
 0x290   : > { %2441 = vrot.lane.b32.xlu1 %v2394_v54, %s4264_s14 }
 0x291   : > { %2330 = vrot.lane.b32.xlu0 %v2283_v16, %s4265_s18 }
 0x294   : > { %2439 = vrot.lane.b32.xlu1 %v2391_v21, %s4264_s14 }
 0x295   : > { %2328 = vrot.lane.b32.xlu0 %v2280_v25, %s4265_s18 }
 0x298   : > { %2437 = vrot.lane.b32.xlu1 %v2389_v33, %s4264_s14 }
 0x299   : > { %2326 = vrot.lane.b32.xlu0 %v2278_v50, %s4265_s18 }
 0x29c   : > { %2475 = vrot.lane.b32.xlu1 %v2436_v58, %s4264_s14 }
 0x29d   : > { %2364 = vrot.lane.b32.xlu0 %v2325_v63, %s4265_s18 }
 0x2a0   : > { %2473 = vrot.lane.b32.xlu1 %v2434_v1, %s4264_s14 }
 0x2a1   : > { %2362 = vrot.lane.b32.xlu0 %v2323_v36, %s4265_s18  ;;  %s5667_s18 = sld [smem:[#allocation17_spill]] }
 0x2a5   : > { %2662 = vperm.xlu0 %4129, %v2537_v23  }
 0x2a7   : > { %s3400_s10 = scalar_lea.hbm %s5667_s18, %s3640_s19 }
 0x2c6   : > { %v2361_v3 = vpop.permute.xlu1 %2360 }
 0x2c7   : > { %v2357_v4 = vpop.permute.xlu0 %2356  ;;  %v2514_v42 = vsel %vm1115_vm1, %v5059_v9, %v2361_v3 }
 0x2c8   : > { %v2512_v5 = vsel %vm1115_vm1, %v5061_v44, %v2357_v4  ;;  %v2995_v4 = vrot.slane %v2981_v53, %v4505_v22 }
 0x2ca   : > { %v2472_v56 = vpop.permute.xlu1 %2471 }
 0x2cb   : > { %v2468_v38 = vpop.permute.xlu0 %2467  ;;  %v5230_v10 = vsel %vm1449_vm4, %v2514_v42, %v2472_v56 }
 0x2cc   : > { %v5233_v40 = vsel %vm1449_vm4, %v2512_v5, %v2468_v38  ;;  %3924 = vmatpush3.xpose.msk.msra.mxu0 %vm1478_vm5, %v5230_v10  ;;  %v2997_v38 = vcombine.high %v2995_v4, %v2995_v4 }
 0x2cd   : > { %3889 = vmatpush3.xpose.msk.msra.mxu1 %vm1478_vm5, %v5233_v40  ;;  %3925 = vmatprep.subr.mxu0 %v4259_v0 }
 0x2ce   : > { %v2466_v9 = vpop.permute.xlu1 %2465  ;;  %3890 = vmatprep.subr.mxu1 %v4259_v0  ;;  %v3025_v51 = vrot.slane %v2997_v38, %v4505_v22 }
 0x2cf   : > { %v2355_v15 = vpop.permute.xlu0 %2354 }
 0x2d0   : > { %v2511_v44 = vsel %vm1115_vm1, %v5069_v20, %v2355_v15  ;;  %v2988_v15 = vrot.slane %v4501_v19, %v4505_v22 }
 0x2d1   : > { %v5244_v11 = vsel %vm1449_vm4, %v2511_v44, %v2466_v9 }
 0x2d2   : > { %3891 = vmatpush3.xpose.msk.msra.mxu1 %vm1478_vm5, %v5244_v11  ;;  %v2470_v52 = vpop.permute.xlu1 %2469 }
 0x2d3   : > { %v2359_v54 = vpop.permute.xlu0 %2358  ;;  %3892 = vmatprep.subr.mxu1 %v4259_v0 }
 0x2d4   : > { %v2513_v20 = vsel %vm1115_vm1, %v5079_v28, %v2359_v54  ;;  %v2996_v54 = vcombine.high %v2988_v15, %v2988_v15 }
 0x2d5   : > { %v5255_v47 = vsel %vm1449_vm4, %v2513_v20, %v2470_v52  ;;  %v3011_v52 = vrot.slane %v2995_v4, %v4505_v22 }
 0x2d6   : > { %3926 = vmatpush3.xpose.msk.msra.mxu0 %vm1478_vm5, %v5255_v47  ;;  %v2464_v7 = vpop.permute.xlu1 %2463 }
 0x2d7   : > { %v2353_v16 = vpop.permute.xlu0 %2352  ;;  %3927 = vmatprep.subr.mxu0 %v4259_v0 }
 0x2d8   : > { %v2510_v17 = vsel %vm1115_vm1, %v5087_v45, %v2353_v16 }
 0x2d9   : > { %v5263_v46 = vsel %vm1449_vm4, %v2510_v17, %v2464_v7  ;;  %v2932_v7 = vcombine.high %v4492_v14, %v4492_v14  ;;  %v3027_v17 = vcombine.high %v3011_v52, %v3011_v52 }
 0x2da   : > { %3893 = vmatpush3.xpose.msk.msra.mxu1 %vm1478_vm5, %v5263_v46  ;;  %3928 = vmatpush3.xpose.msk.msra.mxu0 %vm1478_vm5, %v5233_v40  ;;  %v2462_v28 = vpop.permute.xlu1 %2461 }
 0x2db   : > { %v2351_v21 = vpop.permute.xlu0 %2350  ;;  %3894 = vmatprep.subr.mxu1 %v4259_v0  ;;  %3929 = vmatprep.subr.mxu0 %v4259_v0 }
 0x2dc   : > { %v2509_v24 = vsel %vm1115_vm1, %v5095_v61, %v2351_v21 }
 0x2dd   : > { %v5274_v45 = vsel %vm1449_vm4, %v2509_v24, %v2462_v28  ;;  %v3029_v28 = vcombine.high %v3025_v51, %v3025_v51  ;;  %v3004_v24 = vrot.slane %v2988_v15, %v4505_v22 }
 0x2de   : > { %3895 = vmatpush3.xpose.msk.msra.mxu1 %vm1478_vm5, %v5274_v45  ;;  %3930 = vmatpush3.xpose.msk.msra.mxu0 %vm1478_vm5, %v5244_v11  ;;  %v2460_v25 = vpop.permute.xlu1 %2459 }
 0x2df   : > { %v2349_v26 = vpop.permute.xlu0 %2348  ;;  %3896 = vmatprep.subr.mxu1 %v4259_v0  ;;  %3931 = vmatprep.subr.mxu0 %v4259_v0  ;;  %v3129_v4 = vrot.slane %v3004_v24, %v4513_v29 }
 0x2e0   : > { %v2508_v30 = vsel %vm1115_vm1, %v5103_v2, %v2349_v26 }
 0x2e1   : > { %v5285_v61 = vsel %vm1449_vm4, %v2508_v30, %v2460_v25  ;;  %v3018_v25 = vrot.slane %v2996_v54, %v4505_v22  ;;  %v3145_v30 = vrot.slane %v3011_v52, %v4513_v29 }
 0x2e2   : > { %3897 = vmatpush3.xpose.msk.msra.mxu1 %vm1478_vm5, %v5285_v61  ;;  %3932 = vmatpush3.xpose.msk.msra.mxu0 %vm1478_vm5, %v5263_v46  ;;  %v2458_v33 = vpop.permute.xlu1 %2457 }
 0x2e3   : > { %v2347_v37 = vpop.permute.xlu0 %2346  ;;  %3898 = vmatprep.subr.mxu1 %v4259_v0  ;;  %3933 = vmatprep.subr.mxu0 %v4259_v0 }
 0x2e4   : > { %v2507_v41 = vsel %vm1115_vm1, %v5111_v6, %v2347_v37  ;;  %v2946_v37 = vrot.slane %v2932_v7, %v4505_v22 }
 0x2e5   : > { %v5296_v2 = vsel %vm1449_vm4, %v2507_v41, %v2458_v33  ;;  %v3149_v33 = vrot.slane %v3025_v51, %v4513_v29 }
 0x2e6   : > { %3899 = vmatpush3.xpose.msk.msra.mxu1 %vm1478_vm5, %v5296_v2  ;;  %3934 = vmatpush3.xpose.msk.msra.mxu0 %vm1478_vm5, %v5274_v45  ;;  %v2456_v50 = vpop.permute.xlu1 %2455 }
 0x2e7   : > { %v2345_v49 = vpop.permute.xlu0 %2344  ;;  %3900 = vmatprep.subr.mxu1 %v4259_v0  ;;  %3935 = vmatprep.subr.mxu0 %v4259_v0  ;;  %v3278_v53 = vcombine.low %v3145_v30, %v3149_v33  ;;  %v2538_v30 = vld [vmem:[%s5638_s4] sm:$0xf] }
 0x2e8   : > { %v2506_v55 = vsel %vm1115_vm1, %v5119_v62, %v2345_v49  ;;  %v3157_v49 = vrot.slane %v3029_v28, %v4513_v29 }
 0x2e9   : > { %v5307_v6 = vsel %vm1449_vm4, %v2506_v55, %v2456_v50  ;;  %v3153_v50 = vrot.slane %v3027_v17, %v4513_v29  ;;  %v3286_v51 = vrot.slane %v3278_v53, %v4517_v32 }
 0x2ea   : > { %3901 = vmatpush3.xpose.msk.msra.mxu1 %vm1478_vm5, %v5307_v6  ;;  %3936 = vmatpush3.xpose.msk.msra.mxu0 %vm1478_vm5, %v5285_v61  ;;  %v2454_v58 = vpop.permute.xlu1 %2453 }
 0x2eb   : > { %v2343_v59 = vpop.permute.xlu0 %2342  ;;  %3902 = vmatprep.subr.mxu1 %v4259_v0  ;;  %3937 = vmatprep.subr.mxu0 %v4259_v0 }
 0x2ec   : > { %v2505_v63 = vsel %vm1115_vm1, %v5127_v34, %v2343_v59 }
 0x2ed   : > { %v5318_v62 = vsel %vm1449_vm4, %v2505_v63, %v2454_v58  ;;  %v3026_v58 = vcombine.high %v3004_v24, %v3004_v24 }
 0x2ee   : > { %3903 = vmatpush3.xpose.msk.msra.mxu1 %vm1478_vm5, %v5318_v62  ;;  %3938 = vmatpush3.xpose.msk.msra.mxu0 %vm1478_vm5, %v5296_v2  ;;  %v2452_v1 = vpop.permute.xlu1 %2451 }
 0x2ef   : > { %v2341_v36 = vpop.permute.xlu0 %2340  ;;  %3904 = vmatprep.subr.mxu1 %v4259_v0  ;;  %3939 = vmatprep.subr.mxu0 %v4259_v0 }
 0x2f0   : > { %v2504_v34 = vsel %vm1115_vm1, %v5135_v18, %v2341_v36 }
 0x2f1   : > { %v5331_v3 = vsel %vm1449_vm4, %v2504_v34, %v2452_v1  ;;  %v2948_v1 = vcombine.high %v2946_v37, %v2946_v37  ;;  %v3279_v34 = vcombine.low %v3153_v50, %v3157_v49 }
 0x2f2   : > { %3905 = vmatpush3.xpose.msk.msra.mxu1 %vm1478_vm5, %v5331_v3  ;;  %3940 = vmatpush3.xpose.msk.msra.mxu0 %vm1478_vm5, %v5307_v6  ;;  %v2450_v42 = vpop.permute.xlu1 %2449 }
 0x2f3   : > { %v2339_v56 = vpop.permute.xlu0 %2338  ;;  %3906 = vmatprep.subr.mxu1 %v4259_v0  ;;  %3941 = vmatprep.subr.mxu0 %v4259_v0 }
 0x2f4   : > { %v2503_v18 = vsel %vm1115_vm1, %v5143_v48, %v2339_v56 }
 0x2f5   : > { %v5343_v5 = vsel %vm1449_vm4, %v2503_v18, %v2450_v42  ;;  %v3133_v42 = vrot.slane %v3018_v25, %v4513_v29  ;;  %v3137_v18 = vrot.slane %v3026_v58, %v4513_v29 }
 0x2f6   : > { %3907 = vmatpush3.xpose.msk.msra.mxu1 %vm1478_vm5, %v5343_v5  ;;  %3942 = vmatpush3.xpose.msk.msra.mxu0 %vm1478_vm5, %v5318_v62  ;;  %v2448_v9 = vpop.permute.xlu1 %2447 }
 0x2f7   : > { %v2337_v44 = vpop.permute.xlu0 %2336  ;;  %3908 = vmatprep.subr.mxu1 %v4259_v0  ;;  %3943 = vmatprep.subr.mxu0 %v4259_v0  ;;  %v3261_v54 = vcombine.low %v3129_v4, %v3133_v42 }
 0x2f8   : > { %v2502_v48 = vsel %vm1115_vm1, %v5151_v35, %v2337_v44  ;;  %v2962_v44 = vrot.slane %v2946_v37, %v4505_v22 }
 0x2f9   : > { %v5356_v23 = vsel %vm1449_vm4, %v2502_v48, %v2448_v9  ;;  %v2976_v48 = vrot.slane %v2948_v1, %v4505_v22 }
 0x2fa   : > { %3909 = vmatpush3.xpose.msk.msra.mxu1 %vm1478_vm5, %v5356_v23  ;;  %3944 = vmatpush3.xpose.msk.msra.mxu0 %vm1478_vm5, %v5331_v3  ;;  %v2446_v19 = vpop.permute.xlu1 %2445  ;;  %v2978_v17 = vcombine.high %v2962_v44, %v2962_v44  ;;  %v3113_v49 = vrot.slane %v2962_v44, %v4513_v29 }
 0x2fb   : > { %v2335_v20 = vpop.permute.xlu0 %2334  ;;  %3910 = vmatprep.subr.mxu1 %v4259_v0  ;;  %3945 = vmatprep.subr.mxu0 %v4259_v0  ;;  %v2980_v28 = vcombine.high %v2976_v48, %v2976_v48  ;;  %v3117_v58 = vrot.slane %v2976_v48, %v4513_v29  ;;  %v2890_v48 = vrot.slane %v4489_v13, %v4505_v22 }
 0x2fc   : > { %v2501_v35 = vsel %vm1115_vm1, %v5159_v39, %v2335_v20 }
 0x2fd   : > { %v5371_v16 = vsel %vm1449_vm4, %v2501_v35, %v2446_v19  ;;  %v3293_v19 = vrot.slane %v3279_v34, %v4517_v32 }
 0x2fe   : > { %3911 = vmatpush3.xpose.msk.msra.mxu1 %vm1478_vm5, %v5371_v16  ;;  %3946 = vmatpush3.xpose.msk.msra.mxu0 %vm1478_vm5, %v5343_v5  ;;  %v2444_v21 = vpop.permute.xlu1 %2443 }
 0x2ff   : > { %v2333_v39 = vpop.permute.xlu0 %2332  ;;  %3912 = vmatprep.subr.mxu1 %v4259_v0  ;;  %3947 = vmatprep.subr.mxu0 %v4259_v0  ;;  %v3294_v24 = vcombine.low %v3286_v51, %v3293_v19 }
 0x300   : > { %v2500_v26 = vsel %vm1115_vm1, %v5167_v43, %v2333_v39  ;;  %v3028_v43 = vcombine.high %v3018_v25, %v3018_v25  ;;  %v3269_v25 = vrot.slane %v3261_v54, %v4517_v32  ;;  %v2883_v39 = vcombine.high %v4489_v13, %v4489_v13 }
 0x301   : > { %v2520_v41 = vsel %vm1449_vm4, %v2500_v26, %v2444_v21  ;;  %v2898_v13 = vcombine.high %v2890_v48, %v2890_v48 }
 0x302   : > { %3913 = vmatpush3.xpose.msk.msra.mxu1 %vm1478_vm5, %v2520_v41  ;;  %3948 = vmatpush3.xpose.msk.msra.mxu0 %vm1478_vm5, %v5356_v23  ;;  %v2442_v55 = vpop.permute.xlu1 %2441  ;;  %v3141_v38 = vrot.slane %v3028_v43, %v4513_v29  ;;  %v3121_v43 = vrot.slane %v2978_v17, %v4513_v29  ;;  %v2897_v53 = vrot.slane %v2883_v39, %v4505_v22 }
 0x303   : > { %v2331_v59 = vpop.permute.xlu0 %2330  ;;  %3914 = vmatprep.subr.mxu1 %v4259_v0  ;;  %3949 = vmatprep.subr.mxu0 %v4259_v0 }
 0x304   : > { %v2499_v63 = vsel %vm1115_vm1, %v5175_v57, %v2331_v59  ;;  %v2939_v57 = vrot.slane %v4492_v14, %v4505_v22  ;;  %v3262_v20 = vcombine.low %v3137_v18, %v3141_v38  ;;  %v3125_v59 = vrot.slane %v2980_v28, %v4513_v29 }
 0x305   : > { %v2519_v36 = vsel %vm1449_vm4, %v2499_v63, %v2442_v55  ;;  %v2913_v54 = vrot.slane %v2897_v53, %v4505_v22  ;;  %v2834_v28 = vcombine.high %v4486_v12, %v4486_v12 }
 0x306   : > { %3915 = vmatpush3.xpose.msk.msra.mxu1 %vm1478_vm5, %v2519_v36  ;;  %3950 = vmatpush3.xpose.msk.msra.mxu0 %vm1478_vm5, %v5371_v16  ;;  %v2440_v56 = vpop.permute.xlu1 %2439  ;;  %v2947_v35 = vcombine.high %v2939_v57, %v2939_v57  ;;  %v3276_v33 = vrot.slane %v3262_v20, %v4517_v32  ;;  %v2955_v37 = vrot.slane %v2939_v57, %v4505_v22 }
 0x307   : > { %v2329_v9 = vpop.permute.xlu0 %2328  ;;  %3916 = vmatprep.subr.mxu1 %v4259_v0  ;;  %3951 = vmatprep.subr.mxu0 %v4259_v0  ;;  %v3245_v18 = vcombine.low %v3121_v43, %v3125_v59  ;;  %v2841_v59 = vrot.slane %v4486_v12, %v4505_v22 }
 0x308   : > { %v2498_v15 = vsel %vm1115_vm1, %v5183_v8, %v2329_v9  ;;  %v3097_v57 = vrot.slane %v2955_v37, %v4513_v29 }
 0x309   : > { %v2518_v52 = vsel %vm1449_vm4, %v2498_v15, %v2440_v56  ;;  %v3244_v56 = vcombine.low %v3113_v49, %v3117_v58  ;;  %v2899_v15 = vcombine.high %v2897_v53, %v2897_v53  ;;  %v3259_v51 = vrot.slane %v3245_v18, %v4517_v32 }
 0x30a   : > { %3917 = vmatpush3.xpose.msk.msra.mxu1 %vm1478_vm5, %v2518_v52  ;;  %3952 = vmatpush3.xpose.msk.msra.mxu0 %vm1478_vm5, %v2520_v41  ;;  %v2438_v14 = vpop.permute.xlu1 %2437  ;;  %v2969_v41 = vrot.slane %v2947_v35, %v4505_v22  ;;  %v2849_v12 = vcombine.high %v2841_v59, %v2841_v59  ;;  %v2857_v18 = vrot.slane %v2841_v59, %v4505_v22 }
 0x30b   : > { %v2327_v7 = vpop.permute.xlu0 %2326  ;;  %3918 = vmatprep.subr.mxu1 %v4259_v0  ;;  %3953 = vmatprep.subr.mxu0 %v4259_v0  ;;  %v3252_v52 = vrot.slane %v3244_v56, %v4517_v32 }
 0x30c   : > { %v2497_v8 = vsel %vm1115_vm1, %v5191_v60, %v2327_v7  ;;  %v3585_v60 = vld [vmem:[%s5638_s4 + $0x4] sm:$0xf]  ;;  %v2979_v34 = vcombine.high %v2969_v41, %v2969_v41  ;;  %v3101_v9 = vrot.slane %v2969_v41, %v4513_v29 }
 0x30d   : > { %v2517_v21 = vsel %vm1449_vm4, %v2497_v8, %v2438_v14  ;;  %v2927_v14 = vrot.slane %v2899_v15, %v4505_v22  ;;  %v3260_v35 = vcombine.low %v3252_v52, %v3259_v51  ;;  %v2929_v8 = vcombine.high %v2913_v54, %v2913_v54 }
 0x30e   : > { %3919 = vmatpush3.xpose.msk.msra.mxu1 %vm1478_vm5, %v2517_v21  ;;  %3954 = vmatpush3.xpose.msk.msra.mxu0 %vm1478_vm5, %v2519_v36  ;;  %v2476_v26 = vpop.permute.xlu1 %2475  ;;  %v2977_v36 = vcombine.high %v2955_v37, %v2955_v37  ;;  %v3109_v44 = vrot.slane %v2979_v34, %v4513_v29  ;;  %v3227_v19 = vcombine.low %v3097_v57, %v3101_v9 }
 0x30f   : > { %v2365_v50 = vpop.permute.xlu0 %2364  ;;  %3958 = vmatprep.subr.mxu1 %v4259_v0  ;;  %3993 = vmatprep.subr.mxu0 %v4259_v0  ;;  %v2931_v17 = vcombine.high %v2927_v14, %v2927_v14  ;;  %v2906_v21 = vrot.slane %v2890_v48, %v4505_v22  ;;  %v3085_v39 = vrot.slane %v2927_v14, %v4513_v29 }
 0x310   : > { %v2516_v55 = vsel %vm1115_vm1, %v5203_v27, %v2365_v50  ;;  %v3277_v27 = vcombine.low %v3269_v25, %v3276_v33  ;;  %v3235_v7 = vrot.slane %v3227_v19, %v4517_v32  ;;  %v3081_v25 = vrot.slane %v2913_v54, %v4513_v29 }
 0x311   : > { %v2536_v63 = vsel %vm1449_vm4, %v2516_v55, %v2476_v26  ;;  %3921 = vmatmul.mubr.msk.f32.vlgmr.msra.gmra.mxu1 %vm1478_vm5, %v2538_v30  ;;  %3956 = vmatmul.mubr.msk.f32.vlgmr.msra.gmra.mxu0 %vm1478_vm5, %v3585_v60  ;;  %v3089_v26 = vrot.slane %v2929_v8, %v4513_v29  ;;  %v2848_v30 = vrot.slane %v2834_v28, %v4505_v22 }
 0x312   : > { %3959 = vmatpush3.xpose.msk.msra.mxu1 %vm1478_vm5, %v2536_v63  ;;  %3994 = vmatpush3.xpose.msk.msra.mxu0 %vm1115_vm1, %v3294_v24  ;;  %v2474_v1 = vpop.permute.xlu1 %2473  ;;  %v2928_v33 = vcombine.high %v2906_v21, %v2906_v21  ;;  %v3210_v41 = vcombine.low %v3081_v25, %v3085_v39  ;;  %v3065_v49 = vrot.slane %v2906_v21, %v4513_v29 }
 0x313   : > { %v2363_v4 = vpop.permute.xlu0 %2362  ;;  %3960 = vmatprep.subr.mxu1 %v4259_v0  ;;  %3995 = vmatprep.subr.mxu0 %v4259_v0  ;;  %v2850_v58 = vcombine.high %v2848_v30, %v2848_v30  ;;  %v3033_v51 = vrot.slane %v2857_v18, %v4513_v29 }
 0x314   : > { %v2515_v42 = vsel %vm1115_vm1, %v5211_v31, %v2363_v4  ;;  %3990 = vmatprep.mubr.msk.f32.mxu1 %vm4268_vm10, %v4259_v0  ;;  %4025 = vmatprep.mubr.msk.f32.mxu0 %vm4268_vm10, %v4259_v0  ;;  %v3105_v31 = vrot.slane %v2977_v36, %v4513_v29  ;;  %v3218_v63 = vrot.slane %v3210_v41, %v4517_v32 }
 0x315   : > { %v2535_v38 = vsel %vm1449_vm4, %v2515_v42, %v2474_v1 }
 0x316   : > { %3961 = vmatpush3.xpose.msk.msra.mxu1 %vm1478_vm5, %v2535_v38  ;;  %3996 = vmatpush3.xpose.msk.msra.mxu0 %vm1115_vm1, %v3277_v27  ;;  %v3228_v20 = vcombine.low %v3105_v31, %v3109_v44  ;;  %v2871_v38 = vrot.slane %v2849_v12, %v4505_v22  ;;  %v2879_v44 = vcombine.high %v2857_v18, %v2857_v18 }
 0x317   : > { %3962 = vmatprep.subr.mxu1 %v4259_v0  ;;  %3997 = vmatprep.subr.mxu0 %v4259_v0 }
 0x318   : > { %v3041_v19 = vrot.slane %v2879_v44, %v4513_v29 }
 0x31a   : > { %3963 = vmatpush3.xpose.msk.msra.mxu1 %vm1478_vm5, %v5230_v10  ;;  %3998 = vmatpush3.xpose.msk.msra.mxu0 %vm1115_vm1, %v3294_v24  ;;  %v3242_v10 = vrot.slane %v3228_v20, %v4517_v32  ;;  %v2920_v24 = vrot.slane %v2898_v13, %v4505_v22 }
 0x31b   : > { %3964 = vmatprep.subr.mxu1 %v4259_v0  ;;  %3999 = vmatprep.subr.mxu0 %v4259_v0 }
 0x31c   : > { %v3243_v60 = vcombine.low %v3235_v7, %v3242_v10  ;;  %v2930_v37 = vcombine.high %v2920_v24, %v2920_v24  ;;  %v3069_v55 = vrot.slane %v2920_v24, %v4513_v29 }
 0x31e   : > { %3965 = vmatpush3.xpose.msk.msra.mxu1 %vm1478_vm5, %v5255_v47  ;;  %4000 = vmatpush3.xpose.msk.msra.mxu0 %vm1115_vm1, %v3277_v27  ;;  %v3093_v47 = vrot.slane %v2931_v17, %v4513_v29  ;;  %v3077_v43 = vrot.slane %v2930_v37, %v4513_v29  ;;  %v3193_v1 = vcombine.low %v3065_v49, %v3069_v55 }
 0x31f   : > { %3966 = vmatprep.subr.mxu1 %v4259_v0  ;;  %4001 = vmatprep.subr.mxu0 %v4259_v0  ;;  %v2878_v27 = vrot.slane %v2850_v58, %v4505_v22 }
 0x320   : > { %v3211_v50 = vcombine.low %v3089_v26, %v3093_v47  ;;  %v3201_v4 = vrot.slane %v3193_v1, %v4517_v32 }
 0x321   : > { %v2882_v56 = vcombine.high %v2878_v27, %v2878_v27  ;;  %v3053_v9 = vrot.slane %v2878_v27, %v4513_v29 }
 0x322   : > { %3967 = vmatpush3.xpose.msk.msra.mxu1 %vm1478_vm5, %v5233_v40  ;;  %4002 = vmatpush3.xpose.msk.msra.mxu0 %vm1115_vm1, %v3260_v35  ;;  %v3073_v40 = vrot.slane %v2928_v33, %v4513_v29  ;;  %v3225_v53 = vrot.slane %v3211_v50, %v4517_v32 }
 0x323   : > { %3968 = vmatprep.subr.mxu1 %v4259_v0  ;;  %4003 = vmatprep.subr.mxu0 %v4259_v0 }
 0x324   : > { %v3194_v36 = vcombine.low %v3073_v40, %v3077_v43  ;;  %v3226_v34 = vcombine.low %v3218_v63, %v3225_v53 }
 0x326   : > { %3969 = vmatpush3.xpose.msk.msra.mxu1 %vm1478_vm5, %v5244_v11  ;;  %4004 = vmatpush3.xpose.msk.msra.mxu0 %vm1115_vm1, %v3243_v60  ;;  %v2864_v11 = vrot.slane %v2848_v30, %v4505_v22  ;;  %v2881_v22 = vcombine.high %v2871_v38, %v2871_v38 }
 0x327   : > { %3970 = vmatprep.subr.mxu1 %v4259_v0  ;;  %4005 = vmatprep.subr.mxu0 %v4259_v0 }
 0x328   : > { %v2880_v42 = vcombine.high %v2864_v11, %v2864_v11  ;;  %v3049_v57 = vrot.slane %v2864_v11, %v4513_v29  ;;  %v3045_v54 = vrot.slane %v2881_v22, %v4513_v29 }
 0x32a   : > { %3971 = vmatpush3.xpose.msk.msra.mxu1 %vm1478_vm5, %v5263_v46  ;;  %4006 = vmatpush3.xpose.msk.msra.mxu0 %vm1115_vm1, %v3260_v35  ;;  %v3208_v46 = vrot.slane %v3194_v36, %v4517_v32  ;;  %v3057_v15 = vrot.slane %v2880_v42, %v4513_v29  ;;  %v3176_v48 = vcombine.low %v3049_v57, %v3053_v9 }
 0x32b   : > { %3972 = vmatprep.subr.mxu1 %v4259_v0  ;;  %4007 = vmatprep.subr.mxu0 %v4259_v0  ;;  %v3160_v13 = vcombine.low %v3041_v19, %v3045_v54 }
 0x32c   : > { %v3209_v31 = vcombine.low %v3201_v4, %v3208_v46  ;;  %v3184_v14 = vrot.slane %v3176_v48, %v4517_v32 }
 0x32e   : > { %3973 = vmatpush3.xpose.msk.msra.mxu1 %vm1478_vm5, %v5274_v45  ;;  %4008 = vmatpush3.xpose.msk.msra.mxu0 %vm1115_vm1, %v3243_v60  ;;  %v3061_v45 = vrot.slane %v2882_v56, %v4513_v29 }
 0x32f   : > { %3974 = vmatprep.subr.mxu1 %v4259_v0  ;;  %4009 = vmatprep.subr.mxu0 %v4259_v0 }
 0x330   : > { %v3177_v52 = vcombine.low %v3057_v15, %v3061_v45 }
 0x332   : > { %3975 = vmatpush3.xpose.msk.msra.mxu1 %vm1478_vm5, %v5285_v61  ;;  %4010 = vmatpush3.xpose.msk.msra.mxu0 %vm1115_vm1, %v3226_v34  ;;  %v3037_v61 = vrot.slane %v2871_v38, %v4513_v29 }
 0x333   : > { %3976 = vmatprep.subr.mxu1 %v4259_v0  ;;  %4011 = vmatprep.subr.mxu0 %v4259_v0 }
 0x334   : > { %v3159_v20 = vcombine.low %v3033_v51, %v3037_v61 }
 0x336   : > { %3977 = vmatpush3.xpose.msk.msra.mxu1 %vm1478_vm5, %v5296_v2  ;;  %4012 = vmatpush3.xpose.msk.msra.mxu0 %vm1115_vm1, %v3209_v31  ;;  %v3191_v2 = vrot.slane %v3177_v52, %v4517_v32  ;;  %v3167_v35 = vrot.slane %v3159_v20, %v4517_v32 }
 0x337   : > { %3978 = vmatprep.subr.mxu1 %v4259_v0  ;;  %4013 = vmatprep.subr.mxu0 %v4259_v0 }
 0x338   : > { %v3192_v29 = vcombine.low %v3184_v14, %v3191_v2 }
 0x33a   : > { %3979 = vmatpush3.xpose.msk.msra.mxu1 %vm1478_vm5, %v5307_v6  ;;  %4014 = vmatpush3.xpose.msk.msra.mxu0 %vm1115_vm1, %v3226_v34  ;;  %v3174_v6 = vrot.slane %v3160_v13, %v4517_v32  ;;  %v3603_v32 = vld [vmem:[%s5638_s4 + $0x8] sm:$0xf] }
 0x33b   : > { %3980 = vmatprep.subr.mxu1 %v4259_v0  ;;  %4015 = vmatprep.subr.mxu0 %v4259_v0 }
 0x33c   : > { %v3175_v7 = vcombine.low %v3167_v35, %v3174_v6 }
 0x33e   : > { %3981 = vmatpush3.xpose.msk.msra.mxu1 %vm1478_vm5, %v5318_v62  ;;  %4016 = vmatpush3.xpose.msk.msra.mxu0 %vm1115_vm1, %v3209_v31  ;;  %v3158_v62 = vld [vmem:[%s5635_s1] sm:$0xf] }
 0x33f   : > { %3982 = vmatprep.subr.mxu1 %v4259_v0  ;;  %4017 = vmatprep.subr.mxu0 %v4259_v0 }
 0x342   : > { %3983 = vmatpush3.xpose.msk.msra.mxu1 %vm1478_vm5, %v5331_v3  ;;  %4018 = vmatpush3.xpose.msk.msra.mxu0 %vm1115_vm1, %v3192_v29 }
 0x343   : > { %3984 = vmatprep.subr.mxu1 %v4259_v0  ;;  %4019 = vmatprep.subr.mxu0 %v4259_v0 }
 0x346   : > { %3985 = vmatpush3.xpose.msk.msra.mxu1 %vm1478_vm5, %v5343_v5  ;;  %4020 = vmatpush3.xpose.msk.msra.mxu0 %vm1115_vm1, %v3175_v7 }
 0x347   : > { %3986 = vmatprep.subr.mxu1 %v4259_v0  ;;  %4021 = vmatprep.subr.mxu0 %v4259_v0 }
 0x34a   : > { %3987 = vmatpush3.xpose.msk.msra.mxu1 %vm1478_vm5, %v5356_v23  ;;  %4022 = vmatpush3.xpose.msk.msra.mxu0 %vm1115_vm1, %v3192_v29 }
 0x34b   : > { %3988 = vmatprep.subr.mxu1 %v4259_v0  ;;  %4023 = vmatprep.subr.mxu0 %v4259_v0 }
 0x34e   : > { %3989 = vmatpush3.xpose.msk.msra.mxu1 %vm1478_vm5, %v5371_v16  ;;  %4024 = vmatpush3.xpose.msk.msra.mxu0 %vm1115_vm1, %v3175_v7  ;;  %v2663_v16 = vpop.permute.xlu0 %2662 }
 0x351   : > { %3991 = vmatmul.mubr.msk.f32.vlgmr.msra.gmra.mxu1 %vm1478_vm5, %v3603_v32  ;;  %4026 = vmatmul.mubr.msk.f32.vlgmr.msra.gmra.mxu0 %vm1115_vm1, %v3158_v62 }
 0x3d1   : > { %v2656_v3 = vpop.f32.mrf.mxu1  ;;  %v2743_v0 = vpop.f32.mrf.mxu0 }
 0x3d2   : > { %v2665_v8 = vadd.f32 %v2663_v16, %v2656_v3 }
 0x3d3   : > { %v3922_v5 = vpop.f32.mrf.mxu1  ;;  %v3957_v23 = vpop.f32.mrf.mxu0 }
 0x3d4   : > { %v2747_v17 = vadd.f32 %v2743_v0, %v2665_v8 }
 0x411   : > { %v2825_v28 = vpop.f32.mrf.mxu1  ;;  %v3380_v10 = vpop.f32.mrf.mxu0 }
 0x412   : > { %v2829_v21 = vadd.f32 %v2825_v28, %v2747_v17 }
 0x413   : > { %v3992_v24 = vpop.f32.mrf.mxu1  ;;  %v4027_v25 = vpop.f32.mrf.mxu0 }
 0x414   : > { %v3384_v39 = vadd.f32 %v3380_v10, %v2829_v21 }
 0x416   : > { %3385 = vst [vmem:[%s4681_s13] sm:$0xf] %v3384_v39 }
 0x417   : > { %4171 = shalt.err (!%p4168_p10)
}
 0x418   : > { %s4172_s20 = scalar_lea.hbm %s3400_s10, 64  ;;  %s4176_s21 = scalar_lea.hbm %s5667_s18, 256 }
 0x419   : > { %p4173_p11 = scmp.ne.s32.totalorder %s3400_s10, %s4172_s20  ;;  %p4177_p8 = scmp.lt.s32.totalorder %s3400_s10, %s5667_s18 }
 0x41a   : > { %p4178_p0 = scmp.lt.s32.totalorder %s4176_s21, %s4172_s20 }
 0x41b   : > { %p4174_p13 = pnand %p4173_p11, %p4381_p9 }
 0x41c   : > { %p4179_p2 = por %p4178_p0, %p4177_p8 }
 0x41d   : > { %p4175_p1 = pneg %p4174_p13 }
 0x41f   : > { %p4180_p3 = pnand %p4179_p2, %p4175_p1 }
 0x421   : > { %4183 = shalt.err (!%p4180_p3)
}
 0x422   : > { %4040 = dma.vmem_to_hbm [thread:$0]  (%p4381_p9), %s3403_s15, 64, %s3400_s10, %s3387_s11  }
 0x423 PF: > { %s5668_s22 = sld [smem:[#allocation9_spill]]  ;;  %p4051_p4 = scmp.ge.s32.totalorder %s4254_s12, 2 }
 0x425   : > { %p4047_p5 = pnand %p4051_p4, %p4387_p12 }
 0x427   : > { %p4048_p6 = pneg %p4047_p5 }
 0x429   : > { %s3414_s19 = sand.u32 1, %s5668_s22  }
 0x42a   : > { %s3415_s8 = scalar_lea.sflag [#allocation5], %s3414_s19 }
 0x42b   : > { %4221 = dma.done.wait (%p4048_p6), %s3415_s8, 64  }
 0x42c   : > { %4223 = vsyncadd (%p4048_p6), %s3415_s8, 4294967232  ;;  %s24_s12 = sadd.s32 1, %s4254_s12   ;;  %s5670_s14 = sld [smem:[#allocation16_spill]] }
 0x42d   : > { %p21_p7 = scmp.ge.s32.totalorder %s24_s12, 6   ;;  %s5671_s30 = sld [smem:[#allocation10_spill]] }
 0x42e   : > { %s5672_s9 = sld [smem:[#allocation11_spill]]  ;;  %s5675_s27 = smov %s4230_s28 }
 0x42f   : > { %s5673_s10 = sld [smem:[#allocation12_spill]]  ;;  %s5676_s28 = smov %s4234_s29 }
 0x430   : > { %s5674_s11 = sld [smem:[#allocation13_spill]]  ;;  %23 = sbr.rel (!%p21_p7) target bundleno = 9 (0x9), region = 119 }
 0x432   : > { %s5677_s29 = smov %s5670_s14 }
 0x435   :  { %3420 = vsyncpa [#allocation4], 1 }
 0x436   :  { %3422 = vsyncpa [#allocation4 + $0x1], 1 }
 0x437   :  { %3423 = vsyncpa [#allocation5], 1 }
 0x438   :  { %3425 = vsyncpa [#allocation5 + $0x1], 1 }

</bundles_post_ra>
